<compile_context>
chip_gen: v7x
topology: tpu7x:2x2x1
jax: 0.10.0
libtpu: 0.0.40
codegen_flags: <defaults>
</compile_context>

<pallas_src>
import jax
import jax.numpy as jnp
from jax.experimental import pallas as pl
from jax.experimental.pallas import tpu as pltpu

# --- module hyper-parameters (emb_size=16, 4 combine-schema fields) ----------
EMB_SIZE = 16
NUM_FIELDS = 4                      # feature_count -> sparse_feature_num = 4 * 16
IDS_PER_FIELD = 8                   # ids per field, sum-pooled
VOCAB = 1024                        # synthetic embedding table size
EMB_OUT = NUM_FIELDS * EMB_SIZE     # 64
H1, H2 = 1024, 512
H3 = 1                              # Linear(512, 1) + Sigmoid
H3_PAD = 128                        # lane-dense padded output width
BN_EPS = 1e-5


def _round_up(x, m):
    return (x + m - 1) // m * m


# --------------------------------------------------------------------------- #
# Fused dense kernel: (BN-folded) Linear+ReLU, Linear+ReLU, Linear(pad 128)+Sigmoid
# --------------------------------------------------------------------------- #
def prediction_net_kernel(x_ref, w1_ref, b1_ref, w2_ref, b2_ref, w3_ref, b3_ref,
                          o_ref):
    # MXU dots in bf16, f32 accumulation; elementwise (bias/ReLU/sigmoid) in f32.
    x = x_ref[...].astype(jnp.bfloat16)                               # (TB, 64)
    h = jnp.dot(x, w1_ref[...], preferred_element_type=jnp.float32) + b1_ref[...]
    h = jnp.maximum(h, 0.0)
    h = jnp.dot(h.astype(jnp.bfloat16), w2_ref[...],
                preferred_element_type=jnp.float32) + b2_ref[...]
    h = jnp.maximum(h, 0.0)
    z = jnp.dot(h.astype(jnp.bfloat16), w3_ref[...],
                preferred_element_type=jnp.float32) + b3_ref[...]      # (TB, 128)
    # sigmoid: exp + reciprocal both run on the EUP slot
    o_ref[...] = pl.reciprocal(1.0 + jnp.exp(-z), approx=True)


def fold_bn_into_dense(raw_params):
    """Fold eval-mode BatchNorm1d into the first Linear; pad last Linear to 128 lanes."""
    gamma, beta, mean, var, w1, b1, w2, b2, w3, b3 = raw_params
    scale = gamma / jnp.sqrt(var + BN_EPS)                 # (1, EMB_OUT)
    w1f = w1 * scale.reshape(EMB_OUT, 1)                   # (64, 1024)
    b1f = b1 + (beta - mean * scale) @ w1                  # (1, 1024)
    w3p = jnp.zeros((H2, H3_PAD), jnp.float32).at[:, :H3].set(w3)
    b3p = jnp.zeros((1, H3_PAD), jnp.float32).at[:, :H3].set(b3)
    return (w1f.astype(jnp.bfloat16), b1f.astype(jnp.float32),
            w2.astype(jnp.bfloat16),  b2.astype(jnp.float32),
            w3p.astype(jnp.bfloat16), b3p.astype(jnp.float32))


def prediction_net_dense(x, folded, *, tile_b=None):
    """x: [B, EMB_OUT] f32 -> sigmoid probs [B, 1] f32, single fused Pallas kernel."""
    B, D = x.shape
    assert D == EMB_OUT
    if tile_b is None:
        # Large MXU-friendly batch tile; fits comfortably in VMEM on v5e/v6e/v7x.
        # (Bump the cap to 512 on v6e/v7x if desired.)
        tile_b = min(256, _round_up(B, 8))
    assert tile_b % 8 == 0, "batch tile must be sublane-aligned (multiple of 8)"
    Bp = _round_up(B, tile_b)       # ragged batches are zero-padded, sliced off below
    if Bp != B:
        x = jnp.pad(x, ((0, Bp - B), (0, 0)))
    grid = (Bp // tile_b,)

    w1, b1, w2, b2, w3, b3 = folded

    def resident(shape):
        # Constant block index: the same weight tile is revisited every grid step.
        return pl.BlockSpec(shape, lambda i: (0, 0))

    in_specs = [
        pl.BlockSpec((tile_b, EMB_OUT), lambda i: (i, 0)),   # x, tiled over batch
        resident((EMB_OUT, H1)), resident((1, H1)),          # d1 (BN folded in)
        resident((H1, H2)),      resident((1, H2)),          # d2
        resident((H2, H3_PAD)),  resident((1, H3_PAD)),      # d3 (padded to 128)
    ]
    out_spec = pl.BlockSpec((tile_b, H3_PAD), lambda i: (i, 0))

    flops = 2 * Bp * (EMB_OUT * H1 + H1 * H2 + H2 * H3_PAD)
    bytes_accessed = (Bp * EMB_OUT * 4 + Bp * H3_PAD * 4
                      + (w1.size + w2.size + w3.size) * 2
                      + (b1.size + b2.size + b3.size) * 4)
    cost = pl.CostEstimate(flops=flops,
                           transcendentals=Bp * H3_PAD,
                           bytes_accessed=bytes_accessed)

    out = pl.pallas_call(
        prediction_net_kernel,
        out_shape=jax.ShapeDtypeStruct((Bp, H3_PAD), jnp.float32),
        grid_spec=pltpu.PrefetchScalarGridSpec(
            num_scalar_prefetch=0,
            grid=grid,
            in_specs=in_specs,
            out_specs=out_spec,
        ),
        compiler_params=pltpu.CompilerParams(
            dimension_semantics=("parallel",),   # batch axis shards across v7x TCs
            vmem_limit_bytes=32 << 20,           # real footprint ~4 MiB at tile_b=256
        ),
        cost_estimate=cost,
    )(x, w1, b1, w2, b2, w3, b3)
    return out[:B, :H3]


# --------------------------------------------------------------------------- #
# Sparse part (ps.EmbeddingSumConcat forward math) -- kept as XLA glue.
# --------------------------------------------------------------------------- #
def embedding_sum_concat(ids, emb_table):
    # TODO(synk): ps.EmbeddingSumConcat is a distributed parameter-server lookup with an
    # FTRL updater; only the forward lookup->sum->concat math is modeled, and the
    # data-dependent gather stays in XLA (in-kernel Mosaic gather lowering is shape-
    # restricted and the table round-trip is tiny relative to the MLP).
    emb = jnp.take(emb_table, ids, axis=0)        # [B, F, I, E]
    pooled = jnp.sum(emb, axis=2)                 # [B, F, E]
    return pooled.reshape(ids.shape[0], NUM_FIELDS * EMB_SIZE)  # [B, F*E]


def prediction_net_forward(ids, emb_table, folded_dense, *, tile_b=None):
    x = embedding_sum_concat(ids, emb_table)      # sparse part (glue)
    return prediction_net_dense(x, folded_dense, tile_b=tile_b)  # fused Pallas MLP


# --------------------------------------------------------------------------- #
# Parameter construction (matches the PyTorch initializers in spirit)
# --------------------------------------------------------------------------- #
def init_params(key):
    ks = jax.random.split(key, 8)
    # embedding ~ NormalTensorInitializer(var=1e-4)
    emb_table = jax.random.normal(ks[0], (VOCAB, EMB_SIZE), jnp.float32) * 1e-2
    # BatchNorm1d affine params / running stats (non-trivial so the folding is exercised)
    gamma = 1.0 + 0.1 * jax.random.normal(ks[1], (1, EMB_OUT), jnp.float32)
    beta = 0.1 * jax.random.normal(ks[2], (1, EMB_OUT), jnp.float32)
    mean = 0.01 * jax.random.normal(ks[3], (1, EMB_OUT), jnp.float32)
    var = 1.0 + 0.1 * jax.random.uniform(ks[4], (1, EMB_OUT), jnp.float32)

    # Linear layers stored as [in, out] (== PyTorch weight.T); biases zero
    # (ps.ZeroTensorInitializer in the spec).
    def linear(k, fin, fout):
        bound = 1.0 / jnp.sqrt(fin)
        w = jax.random.uniform(k, (fin, fout), jnp.float32, -bound, bound)
        b = jnp.zeros((1, fout), jnp.float32)
        return w, b

    w1, b1 = linear(ks[5], EMB_OUT, H1)
    w2, b2 = linear(ks[6], H1, H2)
    w3, b3 = linear(ks[7], H2, H3)
    return emb_table, (gamma, beta, mean, var, w1, b1, w2, b2, w3, b3)


if __name__ == "__main__":
    key = jax.random.PRNGKey(0)
    k_param, k_ids = jax.random.split(key)
    emb_table, raw_params = init_params(k_param)
    folded = fold_bn_into_dense(raw_params)

    # Small, deliberately ragged batch: exercises batch padding and a multi-step grid.
    B = 20
    ids = jax.random.randint(k_ids, (B, NUM_FIELDS, IDS_PER_FIELD), 0, VOCAB,
                             dtype=jnp.int32)

    out = prediction_net_forward(ids, emb_table, folded, tile_b=8)
    jax.block_until_ready(out)

    # pure-JAX f32 reference of the original (unfolded, unpadded) forward math
    gamma, beta, mean, var, w1, b1, w2, b2, w3, b3 = raw_params
    x = embedding_sum_concat(ids, emb_table)
    h = (x - mean) * jax.lax.rsqrt(var + BN_EPS) * gamma + beta
    h = jnp.maximum(h @ w1 + b1, 0.0)
    h = jnp.maximum(h @ w2 + b2, 0.0)
    ref = jax.nn.sigmoid(h @ w3 + b3)

    assert out.shape == (B, H3)
    assert bool(jnp.all(jnp.isfinite(out)))
    assert float(jnp.max(jnp.abs(out - ref))) < 1e-2   # bf16-weight tolerance

    print("KERNEL_OK")
</pallas_src>

<mosaic_0001>
module attributes {stable_mosaic.version = 11 : i64} {
  func.func @prediction_net_kernel(%arg0: i32, %arg1: memref<8x64xf32, #tpu.memory_space<vmem>>, %arg2: memref<64x1024xbf16, #tpu.memory_space<vmem>>, %arg3: memref<1x1024xf32, #tpu.memory_space<vmem>>, %arg4: memref<1024x512xbf16, #tpu.memory_space<vmem>>, %arg5: memref<1x512xf32, #tpu.memory_space<vmem>>, %arg6: memref<512x128xbf16, #tpu.memory_space<vmem>>, %arg7: memref<1x128xf32, #tpu.memory_space<vmem>>, %arg8: memref<8x128xf32, #tpu.memory_space<vmem>>) attributes {dimension_semantics = [#tpu.dimension_semantics<parallel>], iteration_bounds = array<i64: 3>, scalar_prefetch = 0 : i64, scratch_operands = 0 : i64, tpu.core_type = #tpu.core_type<tc>, window_params = [{transform_indices = @transform_0, window_bounds = array<i64: 8, 64>}, {pipeline_mode = #tpu.pipeline_mode<synchronous>, transform_indices = @transform_1, window_bounds = array<i64: 64, 1024>}, {pipeline_mode = #tpu.pipeline_mode<synchronous>, transform_indices = @transform_2, window_bounds = array<i64: 1, 1024>}, {pipeline_mode = #tpu.pipeline_mode<synchronous>, transform_indices = @transform_3, window_bounds = array<i64: 1024, 512>}, {pipeline_mode = #tpu.pipeline_mode<synchronous>, transform_indices = @transform_4, window_bounds = array<i64: 1, 512>}, {pipeline_mode = #tpu.pipeline_mode<synchronous>, transform_indices = @transform_5, window_bounds = array<i64: 512, 128>}, {pipeline_mode = #tpu.pipeline_mode<synchronous>, transform_indices = @transform_6, window_bounds = array<i64: 1, 128>}, {transform_indices = @transform_7, window_bounds = array<i64: 8, 128>}]} {
    %c0 = arith.constant 0 : index
    %c0_0 = arith.constant 0 : index
    %0 = vector.load %arg1[%c0, %c0_0] : memref<8x64xf32, #tpu.memory_space<vmem>>, vector<8x64xf32>
    %1 = arith.truncf %0 : vector<8x64xf32> to vector<8x64xbf16>
    %c0_1 = arith.constant 0 : index
    %c0_2 = arith.constant 0 : index
    %2 = vector.load %arg2[%c0_1, %c0_2] : memref<64x1024xbf16, #tpu.memory_space<vmem>>, vector<64x1024xbf16>
    %cst = arith.constant dense<0.000000e+00> : vector<8x1024xf32>
    %3 = tpu.matmul %1, %2, %cst {dimension_numbers = #tpu.dot_dimension_numbers<[1], [0], [0], [1], [0, 0, 1, 1], [], []>} : vector<8x64xbf16>, vector<64x1024xbf16>, vector<8x1024xf32> -> vector<8x1024xf32>
    %c0_3 = arith.constant 0 : index
    %c0_4 = arith.constant 0 : index
    %4 = vector.load %arg3[%c0_3, %c0_4] : memref<1x1024xf32, #tpu.memory_space<vmem>>, vector<1x1024xf32>
    %5 = vector.broadcast %4 : vector<1x1024xf32> to vector<8x1024xf32>
    %6 = arith.addf %3, %5 : vector<8x1024xf32>
    %cst_5 = arith.constant 0.000000e+00 : f32
    %7 = vector.broadcast %cst_5 : f32 to vector<8x1024xf32>
    %8 = arith.maximumf %6, %7 : vector<8x1024xf32>
    %9 = arith.truncf %8 : vector<8x1024xf32> to vector<8x1024xbf16>
    %c0_6 = arith.constant 0 : index
    %c0_7 = arith.constant 0 : index
    %10 = vector.load %arg4[%c0_6, %c0_7] : memref<1024x512xbf16, #tpu.memory_space<vmem>>, vector<1024x512xbf16>
    %cst_8 = arith.constant dense<0.000000e+00> : vector<8x512xf32>
    %11 = tpu.matmul %9, %10, %cst_8 {dimension_numbers = #tpu.dot_dimension_numbers<[1], [0], [0], [1], [0, 0, 1, 1], [], []>} : vector<8x1024xbf16>, vector<1024x512xbf16>, vector<8x512xf32> -> vector<8x512xf32>
    %c0_9 = arith.constant 0 : index
    %c0_10 = arith.constant 0 : index
    %12 = vector.load %arg5[%c0_9, %c0_10] : memref<1x512xf32, #tpu.memory_space<vmem>>, vector<1x512xf32>
    %13 = vector.broadcast %12 : vector<1x512xf32> to vector<8x512xf32>
    %14 = arith.addf %11, %13 : vector<8x512xf32>
    %cst_11 = arith.constant 0.000000e+00 : f32
    %15 = vector.broadcast %cst_11 : f32 to vector<8x512xf32>
    %16 = arith.maximumf %14, %15 : vector<8x512xf32>
    %17 = arith.truncf %16 : vector<8x512xf32> to vector<8x512xbf16>
    %c0_12 = arith.constant 0 : index
    %c0_13 = arith.constant 0 : index
    %18 = vector.load %arg6[%c0_12, %c0_13] : memref<512x128xbf16, #tpu.memory_space<vmem>>, vector<512x128xbf16>
    %cst_14 = arith.constant dense<0.000000e+00> : vector<8x128xf32>
    %19 = tpu.matmul %17, %18, %cst_14 {dimension_numbers = #tpu.dot_dimension_numbers<[1], [0], [0], [1], [0, 0, 1, 1], [], []>} : vector<8x512xbf16>, vector<512x128xbf16>, vector<8x128xf32> -> vector<8x128xf32>
    %c0_15 = arith.constant 0 : index
    %c0_16 = arith.constant 0 : index
    %20 = vector.load %arg7[%c0_15, %c0_16] : memref<1x128xf32, #tpu.memory_space<vmem>>, vector<1x128xf32>
    %21 = vector.broadcast %20 : vector<1x128xf32> to vector<8x128xf32>
    %22 = arith.addf %19, %21 : vector<8x128xf32>
    %cst_17 = arith.constant 0.000000e+00 : f32
    %23 = vector.broadcast %cst_17 : f32 to vector<8x128xf32>
    %24 = arith.subf %23, %22 : vector<8x128xf32>
    %25 = math.exp %24 : vector<8x128xf32>
    %cst_18 = arith.constant 1.000000e+00 : f32
    %26 = vector.broadcast %cst_18 : f32 to vector<8x128xf32>
    %27 = arith.addf %26, %25 : vector<8x128xf32>
    %28 = tpu.reciprocal %27 {approx = true} : vector<8x128xf32> -> vector<8x128xf32>
    %c0_19 = arith.constant 0 : index
    %c0_20 = arith.constant 0 : index
    %29 = vector.load %arg8[%c0_19, %c0_20] : memref<8x128xf32, #tpu.memory_space<vmem>>, vector<8x128xf32>
    tpu.vector_store %arg8[%c0_19, %c0_20], %28 {strides = array<i32>} : memref<8x128xf32, #tpu.memory_space<vmem>>, vector<8x128xf32>,
    return
  }
  func.func @transform_0(%arg0: i32) -> (i32, i32) {
    %c0_i32 = arith.constant 0 : i32
    %c0_i32_0 = arith.constant 0 : i32
    return %arg0, %c0_i32 : i32, i32
  }
  func.func @transform_1(%arg0: i32) -> (i32, i32) {
    %c0_i32 = arith.constant 0 : i32
    %c0_i32_0 = arith.constant 0 : i32
    %c0_i32_1 = arith.constant 0 : i32
    return %c0_i32, %c0_i32_0 : i32, i32
  }
  func.func @transform_2(%arg0: i32) -> (i32, i32) {
    %c0_i32 = arith.constant 0 : i32
    %c0_i32_0 = arith.constant 0 : i32
    %c0_i32_1 = arith.constant 0 : i32
    return %c0_i32, %c0_i32_0 : i32, i32
  }
  func.func @transform_3(%arg0: i32) -> (i32, i32) {
    %c0_i32 = arith.constant 0 : i32
    %c0_i32_0 = arith.constant 0 : i32
    %c0_i32_1 = arith.constant 0 : i32
    return %c0_i32, %c0_i32_0 : i32, i32
  }
  func.func @transform_4(%arg0: i32) -> (i32, i32) {
    %c0_i32 = arith.constant 0 : i32
    %c0_i32_0 = arith.constant 0 : i32
    %c0_i32_1 = arith.constant 0 : i32
    return %c0_i32, %c0_i32_0 : i32, i32
  }
  func.func @transform_5(%arg0: i32) -> (i32, i32) {
    %c0_i32 = arith.constant 0 : i32
    %c0_i32_0 = arith.constant 0 : i32
    %c0_i32_1 = arith.constant 0 : i32
    return %c0_i32, %c0_i32_0 : i32, i32
  }
  func.func @transform_6(%arg0: i32) -> (i32, i32) {
    %c0_i32 = arith.constant 0 : i32
    %c0_i32_0 = arith.constant 0 : i32
    %c0_i32_1 = arith.constant 0 : i32
    return %c0_i32, %c0_i32_0 : i32, i32
  }
  func.func @transform_7(%arg0: i32) -> (i32, i32) {
    %c0_i32 = arith.constant 0 : i32
    %c0_i32_0 = arith.constant 0 : i32
    return %arg0, %c0_i32 : i32, i32
  }
}

</mosaic_0001>

<bundles_post_ra>
// kernel: tpu_custom_call.1
= control target key start
LH: loop header
LB: loop body
LE: loop exit
PB: predicated region body
PF: predicated region fallthrough
CT: control target
= control target key end

     0   :  { %12 = vsyncpa [#allocation3], 0  ;;  %s4690_s0 = inlined_call_operand.hbm [shape: f32[24,64], index: 0, kind: input, shape index: {}]   ;;  %s4691_s1 = inlined_call_operand.hbm [shape: bf16[64,1024], index: 1, kind: input, shape index: {}]   ;;  %s4692_s2 = inlined_call_operand.hbm [shape: f32[1,1024], index: 2, kind: input, shape index: {}]   ;;  %s4693_s3 = inlined_call_operand.hbm [shape: bf16[1024,512], index: 3, kind: input, shape index: {}]   ;;  %s4694_s4 = inlined_call_operand.vmem [shape: f32[1,512], index: 4, kind: input, shape index: {}]   ;;  %s4695_s5 = inlined_call_operand.hbm [shape: bf16[512,128], index: 5, kind: input, shape index: {}]   ;;  %s4696_s6 = inlined_call_operand.vmem [shape: f32[1,128], index: 6, kind: input, shape index: {}]   ;;  %s4697_s7 = inlined_call_operand.hbm [shape: f32[24,128], index: 7, kind: output, shape index: {}]  }
   0x1   :  { %14 = vsyncpa [#allocation3 + $0x1], 0 }
   0x2   :  { %15 = vsyncpa [#allocation6], 0 }
   0x3   :  { %16 = vsyncpa [#allocation9], 0 }
   0x4   :  { %17 = vsyncpa [#allocation4], 0 }
   0x5   :  { %19 = vsyncpa [#allocation4 + $0x1], 0  ;;  %s4338_s24 = smov 0   ;;  %s4340_s25 = smov 0  }
   0x6   :  { %s4342_s26 = smov 0   ;;  %s4344_s27 = smov 0  }
   0x7 LB: > { %s4285_s28 = smov [#allocation5]   ;;  %s4359_s30 = sadd.s32 4294967295, %s4283_s27   ;;  %s4283_s27 = sphi %s4344_s27, %s4720_s27   ;;  %s4279_s26 = sphi %s4342_s26, %s4719_s26   ;;  %s4275_s25 = sphi %s4340_s25, %s4718_s25   ;;  %s4271_s24 = sphi %s4338_s24, %s4717_s24  }
   0x8   : > { %s220_s29 = sshll.u32 %s4285_s28, 4  ;;  %p3137_p0 = scmp.ge.s32.totalorder %s4283_s27, 1  ;;  %s4364_s29 = int_to_ptr.vmem [resolvable:$true] %s220_s29 }
   0x9   : > { %p4698_p1 = scmp.eq.s32.totalorder %s4359_s30, 0  ;;  %p208_p2 = scmp.lt.s32.totalorder %s4283_s27, 4 }
   0xa   : > { %s4286_s9 = smov [#allocation8]   ;;  %s4287_s12 = smov [#allocation7]  }
   0xb   : > { %p4366_p3 = pnand %p3137_p0, %p208_p2  ;;  %s244_s10 = sshll.u32 %s4286_s9, 4  ;;  %s4378_s10 = int_to_ptr.vmem [resolvable:$true] %s244_s10 }
   0xc   : > { %s4380_s13 = sshll.u32 %s4287_s12, 4  ;;  %s4067_s16 = scalar_lea.hbm %s4691_s1, 4096  ;;  %s235_s13 = int_to_ptr.vmem [resolvable:$true] %s4380_s13 }
   0xd   : > { %s4701_s8 = scalar_select %p4366_p3, 1, 0 }
   0xe   : > { %p3573_p4 = pneg %p4366_p3  ;;  %p4068_p6 = scmp.ne.s32.totalorder %s4691_s1, %s4067_s16 }
   0xf   : > { %p4074_p10 = scmp.lt.u32.totalorder %s4067_s16, %s4691_s1 }
  0x10   : > { %p4374_p5 = pnand %p3573_p4, %p4698_p1 }
  0x12   : > { %p4390_p7 = pneg %p4374_p5 }
  0x14   : > { %p4070_p8 = pnand %p4390_p7, %p4068_p6 }
  0x16   : > { %p4071_p9 = pneg %p4070_p8 }
  0x18   : > { %p4076_p11 = pnand %p4074_p10, %p4071_p9 }
  0x1a   : > { %4079 = shalt.err (!%p4076_p11)
}
  0x1b   : > { %s4080_s22 = scalar_lea.vmem %s4364_s29, 4096  ;;  %p4088_p2 = scmp.lt.s32.totalorder %s4364_s29, %s4364_s29 }
  0x1c   : > { %p4081_p12 = scmp.ne.s32.totalorder %s4364_s29, %s4080_s22  ;;  %p4089_p4 = scmp.lt.s32.totalorder %s4080_s22, %s4080_s22 }
  0x1e   : > { %p4083_p13 = pnand %p4081_p12, %p4390_p7  ;;  %p4090_p6 = por %p4089_p4, %p4088_p2 }
  0x20   : > { %p4084_p0 = pneg %p4083_p13 }
  0x22   : > { %p4091_p8 = pnand %p4090_p6, %p4084_p0 }
  0x24   : > { %4094 = shalt.err (!%p4091_p8)
}
  0x25   : > { %s4288_s23 = smov 512   ;;  %s4289_s28 = smov 32  }
  0x26   : > { %3576 = dma.hbm_to_vmem [thread:$0]  (!%p4374_p5), %s4691_s1, 4096, %s4364_s29, [#allocation6], %s4288_s23, %s4288_s23, %s4289_s28  }
  0x27   : > { %s4095_s16 = scalar_lea.hbm %s4693_s3, 32768 }
  0x28   : > { %p4096_p9 = scmp.ne.s32.totalorder %s4693_s3, %s4095_s16  ;;  %p4102_p12 = scmp.lt.u32.totalorder %s4095_s16, %s4693_s3 }
  0x2a   : > { %p4098_p10 = pnand %p4096_p9, %p4390_p7 }
  0x2c   : > { %p4099_p11 = pneg %p4098_p10 }
  0x2e   : > { %p4104_p13 = pnand %p4102_p12, %p4099_p11 }
  0x30   : > { %4107 = shalt.err (!%p4104_p13)
}
  0x31   : > { %s4108_s29 = scalar_lea.vmem %s4378_s10, 32768  ;;  %p4116_p6 = scmp.lt.s32.totalorder %s4378_s10, %s4378_s10 }
  0x32   : > { %p4109_p0 = scmp.ne.s32.totalorder %s4378_s10, %s4108_s29  ;;  %p4117_p8 = scmp.lt.s32.totalorder %s4108_s29, %s4108_s29 }
  0x34   : > { %p4111_p2 = pnand %p4109_p0, %p4390_p7  ;;  %p4118_p9 = por %p4117_p8, %p4116_p6 }
  0x36   : > { %p4112_p4 = pneg %p4111_p2 }
  0x38   : > { %p4119_p10 = pnand %p4118_p9, %p4112_p4 }
  0x3a   : > { %4122 = shalt.err (!%p4119_p10)
}
  0x3b   : > { %s4290_s22 = smov 256   ;;  %s4291_s23 = smov 16  }
  0x3c   : > { %3582 = dma.hbm_to_vmem [thread:$0]  (!%p4374_p5), %s4693_s3, 32768, %s4378_s10, [#allocation9], %s4290_s22, %s4290_s22, %s4291_s23  }
  0x3d   : > { %s4123_s15 = scalar_lea.hbm %s4692_s2, 128 }
  0x3e   : > { %p4124_p11 = scmp.ne.s32.totalorder %s4692_s2, %s4123_s15  ;;  %p4130_p0 = scmp.lt.u32.totalorder %s4123_s15, %s4692_s2 }
  0x40   : > { %p4126_p12 = pnand %p4124_p11, %p4390_p7 }
  0x42   : > { %p4127_p13 = pneg %p4126_p12 }
  0x44   : > { %p4132_p2 = pnand %p4130_p0, %p4127_p13 }
  0x46   : > { %4135 = shalt.err (!%p4132_p2)
}
  0x47   : > { %s4136_s21 = scalar_lea.vmem %s235_s13, 128  ;;  %p4144_p9 = scmp.lt.s32.totalorder %s235_s13, %s235_s13 }
  0x48   : > { %p4137_p4 = scmp.ne.s32.totalorder %s235_s13, %s4136_s21  ;;  %p4145_p10 = scmp.lt.s32.totalorder %s4136_s21, %s4136_s21 }
  0x4a   : > { %p4139_p6 = pnand %p4137_p4, %p4390_p7  ;;  %p4146_p1 = por %p4145_p10, %p4144_p9 }
  0x4c   : > { %p4140_p8 = pneg %p4139_p6 }
  0x4e   : > { %p4147_p3 = pnand %p4146_p1, %p4140_p8 }
  0x50   : > { %4150 = shalt.err (!%p4147_p3)
}
  0x51   : > { %3579 = dma.hbm_to_vmem [thread:$0]  (!%p4374_p5), %s4692_s2, 128, %s235_s13, [#allocation6]  }
  0x52   : > { %s4292_s22 = smov [#allocation10]   ;;  %s4151_s12 = scalar_lea.hbm %s4695_s5, 4096 }
  0x53   : > { %s260_s23 = sshll.u32 %s4292_s22, 4  ;;  %p4152_p11 = scmp.ne.s32.totalorder %s4695_s5, %s4151_s12  ;;  %s261_s23 = int_to_ptr.vmem [resolvable:$true] %s260_s23 }
  0x54   : > { %p4158_p12 = scmp.lt.u32.totalorder %s4151_s12, %s4695_s5 }
  0x55   : > { %p4154_p1 = pnand %p4152_p11, %p4390_p7 }
  0x57   : > { %p4155_p3 = pneg %p4154_p1 }
  0x59   : > { %p4160_p13 = pnand %p4158_p12, %p4155_p3 }
  0x5b   : > { %4163 = shalt.err (!%p4160_p13)
}
  0x5c   : > { %s4164_s13 = scalar_lea.vmem %s261_s23, 4096  ;;  %p4172_p6 = scmp.lt.s32.totalorder %s261_s23, %s261_s23 }
  0x5d   : > { %p4165_p0 = scmp.ne.s32.totalorder %s261_s23, %s4164_s13  ;;  %p4173_p8 = scmp.lt.s32.totalorder %s4164_s13, %s4164_s13 }
  0x5f   : > { %p4167_p2 = pnand %p4165_p0, %p4390_p7  ;;  %p4174_p9 = por %p4173_p8, %p4172_p6 }
  0x61   : > { %p4168_p4 = pneg %p4167_p2 }
  0x63   : > { %p4175_p10 = pnand %p4174_p9, %p4168_p4 }
  0x65   : > { %4178 = shalt.err (!%p4175_p10)
}
  0x66   : > { %s4293_s18 = smov 64   ;;  %s4294_s19 = smov 4  }
  0x67   : > { %3585 = dma.hbm_to_vmem [thread:$0]  (!%p4374_p5), %s4695_s5, 4096, %s261_s23, [#allocation9], %s4293_s18, %s4293_s18, %s4294_s19  }
  0x68   : > { %s3136_s10 = sadd.s32 4294967294, %s4283_s27   ;;  %s4473_s29 = sadd.s32 1, %s4283_s27  }
  0x69   : > { %s29_s22 = ssub.s32 %s4283_s27, %s4473_s29  ;;  %s32_s28 = sadd.s32 1, %s4279_s26 }
  0x6a   : > { %p30_p7 = scmp.eq.s32.totalorder %s29_s22, 0  ;;  %p39_p11 = scmp.ne.s32.totalorder %s4279_s26, %s4275_s25 }
  0x6b   : > { %p40_p1 = scmp.eq.s32.totalorder %s4283_s27, 0  ;;  %p45_p3 = scmp.ne.s32.totalorder %s4275_s25, %s4271_s24 }
  0x6c   : > { %s4484_s9 = scalar_select %p30_p7, %s4279_s26, %s32_s28  }
  0x6d   : > { %p4486_p12 = por %p40_p1, %p39_p11  ;;  %p4705_p13 = scmp.eq.s32.totalorder %s4359_s30, 0 }
  0x6e   : > { %p195_p0 = scmp.eq.s32.totalorder %s4359_s30, 2  ;;  %p201_p2 = scmp.eq.s32.totalorder %s3136_s10, 2 }
  0x6f   : > { %p4492_p5 = por %p4705_p13, %p45_p3  ;;  %p3598_p4 = scmp.lt.s32.totalorder %s4283_s27, 3 }
  0x70   : > { %s277_s12 = sand.u32 1, %s4279_s26   ;;  %p4499_p6 = por %p195_p0, %p39_p11 }
  0x71   : > { %p4503_p8 = por %p201_p2, %p45_p3  ;;  %s3143_s16 = sshll.u32 %s277_s12, 3 }
  0x72   : > { %s4707_s14 = scalar_select %p4499_p6, 1, 0 }
  0x73   : > { %s4708_s15 = scalar_select %p4503_p8, 1, 0 }
  0x74   : > { %s3144_s17 = sshll.u32 %s4283_s27, 7  ;;  %s281_s20 = scalar_lea.vmem [#allocation2], %s3143_s16 }
  0x75   : > { %s4511_s19 = scalar_lea.hbm %s4690_s0, %s3144_s17  ;;  %s288_s21 = sshll.u32 %s281_s20, 4  ;;  %s4513_s21 = int_to_ptr.vmem [resolvable:$true] %s288_s21 }
  0x76   : > { %p4517_p9 = pnand %p3598_p4, %p4486_p12  ;;  %s278_s22 = scalar_lea.sflag [#allocation3], %s277_s12 }
  0x77   : > { %s4179_s28 = scalar_lea.hbm %s4511_s19, 128  ;;  %s4184_s13 = scalar_lea.hbm %s4690_s0, 384 }
  0x78   : > { %p4180_p10 = scmp.ne.s32.totalorder %s4511_s19, %s4179_s28  ;;  %p4181_p7 = pneg %p4517_p9 }
  0x79   : > { %p4185_p3 = scmp.lt.u32.totalorder %s4511_s19, %s4690_s0  ;;  %p4186_p12 = scmp.lt.u32.totalorder %s4184_s13, %s4179_s28 }
  0x7a   : > { %p4182_p11 = pnand %p4181_p7, %p4180_p10  ;;  %p4188_p0 = scmp.lt.u32.totalorder %s4179_s28, %s4511_s19 }
  0x7b   : > { %p4187_p13 = por %p4186_p12, %p4185_p3 }
  0x7c   : > { %p4183_p1 = pneg %p4182_p11 }
  0x7d   : > { %p4189_p2 = por %p4188_p0, %p4187_p13 }
  0x7f   : > { %p4190_p4 = pnand %p4189_p2, %p4183_p1 }
  0x81   : > { %4193 = shalt.err (!%p4190_p4)
}
  0x82   : > { %s4194_s12 = scalar_lea.vmem %s4513_s21, 128  ;;  %s4295_s20 = smov [#allocation2]  }
  0x83   : > { %p4195_p10 = scmp.ne.s32.totalorder %s4513_s21, %s4194_s12  ;;  %s4199_s16 = sshll.u32 %s4295_s20, 4  ;;  %s4200_s16 = int_to_ptr.vmem [resolvable:$false] %s4199_s16 }
  0x84   : > { %s4201_s17 = scalar_lea.vmem %s4200_s16, 256  ;;  %p4202_p6 = scmp.lt.s32.totalorder %s4513_s21, %s4200_s16 }
  0x85   : > { %p4197_p11 = pnand %p4195_p10, %p4181_p7  ;;  %p4203_p3 = scmp.lt.s32.totalorder %s4201_s17, %s4194_s12 }
  0x87   : > { %p4198_p8 = pneg %p4197_p11  ;;  %p4204_p12 = por %p4203_p3, %p4202_p6 }
  0x89   : > { %p4205_p13 = pnand %p4204_p12, %p4198_p8 }
  0x8b   : > { %4208 = shalt.err (!%p4205_p13)
}
  0x8c   : > { %3589 = dma.hbm_to_vmem [thread:$0]  (!%p4517_p9), %s4511_s19, 128, %s4513_s21, %s278_s22  }
  0x8d   : > { %p4710_p1 = scmp.ne.s32.totalorder %s4701_s8, 0 }
  0x8e   : > { %s4549_s28 = sand.u32 (!%p4710_p1), 1, %s4275_s25  }
  0x8f   : > { %297 = sbr.rel (%p4710_p1) target bundleno = 1070 (0x42e), region = 48  ;;  %s3146_s13 = sshll.u32 (!%p4710_p1), %s4549_s28, 3 }
  0x90   : > { %s300_s11 = scalar_lea.sflag (!%p4710_p1), [#allocation3], %s4549_s28  ;;  %s4555_s18 = scalar_lea.vmem (!%p4710_p1), [#allocation2], %s3146_s13 }
  0x96   : > { %4254 = dma.done.wait (%p4492_p5), %s300_s11, 128  }
  0x97   : > { %4256 = vsyncadd (%p4492_p5), %s300_s11, 4294967168  ;;  %p4711_p6 = scmp.eq.s32.totalorder %s4359_s30, 0 }
  0x99   : > { %4258 = dma.done.wait (%p4711_p6), [#allocation6], 4224   ;;  %p4712_p8 = pmov %p4711_p6 }
  0x9a   : > { %p4713_p9 = pmov %p4711_p6 }
  0x9b   : > { %4260 = vsyncadd (%p4712_p8), [#allocation6], 4294963072 }
  0x9c   : > { %4262 = dma.done.wait (%p4713_p9), [#allocation9], 36864   ;;  %p4714_p7 = pmov %p4711_p6 }
  0x9d   : > { %v4296_v0 = vmov 0   ;;  %v353_v1 = vld [vmem:[#allocation5] sm:$0xff]  ;;  %v354_v10 = vld [vmem:[#allocation5 + $0x8] sm:$0xff]  ;;  %v355_v29 = vld [vmem:[#allocation5 + $0x10] sm:$0xff]  ;;  %vm587_vm0 = vcmask 523264   ;;  %s3478_s10 = sshll.u32 %s4359_s30, 7 }
  0x9e   : > { %4264 = vsyncadd (%p4714_p7), [#allocation9], 4294930432  ;;  %623 = vmatprep.mubr.bf16.mxu0 %v4296_v0  ;;  %664 = vmatprep.mubr.bf16.mxu1 %v4296_v0  ;;  %v357_v2 = vld [vmem:[#allocation5 + $0x20] sm:$0xff]  ;;  %v358_v11 = vld [vmem:[#allocation5 + $0x28] sm:$0xff]  ;;  %s349_s22 = scalar_lea.vmem [#allocation11], %s3146_s13  ;;  %s4647_s17 = scalar_lea.hbm %s4697_s7, %s3478_s10 }
  0x9f   : > { %v361_v3 = vld [vmem:[#allocation5 + $0x40] sm:$0xff]  ;;  %v3153_v4 = vcombine.high %v353_v1, %v357_v2  ;;  %v3152_v5 = vcombine.low %v353_v1, %v357_v2  ;;  %v362_v12 = vld [vmem:[#allocation5 + $0x48] sm:$0xff]  ;;  %v3155_v14 = vcombine.high %v354_v10, %v358_v11  ;;  %v3154_v15 = vcombine.low %v354_v10, %v358_v11  ;;  %v359_v30 = vld [vmem:[#allocation5 + $0x30] sm:$0xff]  ;;  %s3028_s12 = sshll.u32 %s349_s22, 4  ;;  %s3015_s11 = scalar_lea.sflag [#allocation4], %s4549_s28  ;;  %s4649_s12 = int_to_ptr.vmem [resolvable:$true] %s3028_s12 }
  0xa0   : > { %v365_v6 = vld [vmem:[#allocation5 + $0x60] sm:$0xff]  ;;  %v366_v16 = vld [vmem:[#allocation5 + $0x68] sm:$0xff]  ;;  %v351_v33 = vld [vmem:[%s4555_s18] sm:$0xff]  ;;  %v3157_v35 = vcombine.high %v355_v29, %v359_v30  ;;  %v3156_v42 = vcombine.low %v355_v29, %v359_v30  ;;  %s4209_s18 = scalar_lea.vmem %s4649_s12, 128  ;;  %p4715_p0 = scmp.ne.s32.totalorder %s4707_s14, 0 }
  0xa1   : > { %v3161_v7 = vcombine.high %v361_v3, %v365_v6  ;;  %v369_v8 = vld [vmem:[#allocation5 + $0x80] sm:$0xff]  ;;  %591 = vmatprep.subr.bf16.mxu0 %v3153_v4  ;;  %v3160_v13 = vcombine.low %v361_v3, %v365_v6  ;;  %v3163_v18 = vcombine.high %v362_v12, %v366_v16  ;;  %v370_v19 = vld [vmem:[#allocation5 + $0x88] sm:$0xff]  ;;  %632 = vmatprep.subr.bf16.mxu1 %v3155_v14  ;;  %v363_v36 = vld [vmem:[#allocation5 + $0x50] sm:$0xff]  ;;  %p4210_p5 = scmp.ne.s32.totalorder %s4649_s12, %s4209_s18  ;;  %s4297_s30 = smov [#allocation11]  }
  0xa2   : > { %v373_v9 = vld [vmem:[#allocation5 + $0xa0] sm:$0xff]  ;;  %592 = vmatpush1.bf16.msra.mxu0 %v3152_v5  ;;  %v374_v20 = vld [vmem:[#allocation5 + $0xa8] sm:$0xff]  ;;  %633 = vmatpush1.bf16.msra.mxu1 %v3154_v15  ;;  %v3162_v23 = vcombine.low %v362_v12, %v366_v16  ;;  %v367_v37 = vld [vmem:[#allocation5 + $0x70] sm:$0xff]  ;;  %v4572_v40 = vpack.c.bf16 %v351_v33, %v351_v33  ;;  %s4213_s13 = sshll.u32 %s4297_s30, 4  ;;  %s4214_s13 = int_to_ptr.vmem [resolvable:$false] %s4213_s13 }
  0xa3   : > { %593 = vmatprep.subr.bf16.mxu0 %v3161_v7  ;;  %v3169_v17 = vcombine.high %v369_v8, %v373_v9  ;;  %v377_v21 = vld [vmem:[#allocation5 + $0xc0] sm:$0xff]  ;;  %v3168_v24 = vcombine.low %v369_v8, %v373_v9  ;;  %634 = vmatprep.subr.bf16.mxu1 %v3163_v18  ;;  %v3171_v25 = vcombine.high %v370_v19, %v374_v20  ;;  %v378_v27 = vld [vmem:[#allocation5 + $0xc8] sm:$0xff]  ;;  %v356_v38 = vld [vmem:[#allocation5 + $0x18] sm:$0xff]  ;;  %p4211_p2 = pnand %p4210_p5, %p4715_p0  ;;  %s4215_s8 = scalar_lea.vmem %s4214_s13, 256 }
  0xa4   : > { %v381_v22 = vld [vmem:[#allocation5 + $0xe0] sm:$0xff]  ;;  %v382_v28 = vld [vmem:[#allocation5 + $0xe8] sm:$0xff]  ;;  %v3170_v31 = vcombine.low %v370_v19, %v374_v20  ;;  %v360_v39 = vld [vmem:[#allocation5 + $0x38] sm:$0xff]  ;;  %v3165_v43 = vcombine.high %v363_v36, %v367_v37  ;;  %v3164_v50 = vcombine.low %v363_v36, %v367_v37  ;;  %p4216_p10 = scmp.lt.s32.totalorder %s4649_s12, %s4214_s13  ;;  %p4217_p11 = scmp.lt.s32.totalorder %s4215_s8, %s4209_s18 }
  0xa5   : > { %v3177_v26 = vcombine.high %v377_v21, %v381_v22  ;;  %v3176_v32 = vcombine.low %v377_v21, %v381_v22  ;;  %v3179_v34 = vcombine.high %v378_v27, %v382_v28  ;;  %v3178_v41 = vcombine.low %v378_v27, %v382_v28  ;;  %v364_v45 = vld [vmem:[#allocation5 + $0x58] sm:$0xff]  ;;  %v371_v47 = vld [vmem:[#allocation5 + $0x90] sm:$0xff]  ;;  %p4212_p4 = pneg %p4211_p2 }
  0xa6   : > { %594 = vmatpush1.bf16.msra.mxu0 %v3160_v13  ;;  %635 = vmatpush1.bf16.msra.mxu1 %v3162_v23  ;;  %v3159_v44 = vcombine.high %v356_v38, %v360_v39  ;;  %v368_v46 = vld [vmem:[#allocation5 + $0x78] sm:$0xff]  ;;  %v375_v48 = vld [vmem:[#allocation5 + $0xb0] sm:$0xff]  ;;  %v3158_v49 = vcombine.low %v356_v38, %v360_v39  ;;  %p4218_p3 = por %p4217_p11, %p4216_p10 }
  0xa7   : > { %595 = vmatprep.subr.bf16.mxu0 %v3169_v17  ;;  %636 = vmatprep.subr.bf16.mxu1 %v3171_v25  ;;  %v3167_v51 = vcombine.high %v364_v45, %v368_v46  ;;  %v3173_v52 = vcombine.high %v371_v47, %v375_v48  ;;  %v372_v53 = vld [vmem:[#allocation5 + $0x98] sm:$0xff]  ;;  %v379_v55 = vld [vmem:[#allocation5 + $0xd0] sm:$0xff]  ;;  %v3166_v57 = vcombine.low %v364_v45, %v368_v46 }
  0xa8   : > { %v376_v54 = vld [vmem:[#allocation5 + $0xb8] sm:$0xff]  ;;  %v383_v56 = vld [vmem:[#allocation5 + $0xf0] sm:$0xff]  ;;  %v3172_v58 = vcombine.low %v371_v47, %v375_v48  ;;  %p4219_p12 = pnand %p4218_p3, %p4212_p4 }
  0xa9   : > { %v3175_v59 = vcombine.high %v372_v53, %v376_v54  ;;  %v3181_v60 = vcombine.high %v379_v55, %v383_v56  ;;  %v380_v61 = vld [vmem:[#allocation5 + $0xd8] sm:$0xff]  ;;  %v3174_v63 = vcombine.low %v372_v53, %v376_v54  ;;  %v3180_v1 = vcombine.low %v379_v55, %v383_v56  ;;  %v3650_v7 = vld [vmem:[#allocation8 + $0x8] ss:$16 sps:$4 sm:$0xff]   ;;  %v3658_v9 = vld [vmem:[#allocation8 + $0x2c] ss:$16 sps:$4 sm:$0xff]  }
  0xaa   : > { %596 = vmatpush1.bf16.msra.mxu0 %v3168_v24  ;;  %637 = vmatpush1.bf16.msra.mxu1 %v3170_v31  ;;  %v384_v62 = vld [vmem:[#allocation5 + $0xf8] sm:$0xff]  ;;  %v3656_v11 = vld [vmem:[#allocation8 + $0x28] ss:$16 sps:$4 sm:$0xff]   ;;  %v3664_v13 = vld [vmem:[#allocation8 + $0x4c] ss:$16 sps:$4 sm:$0xff]  }
  0xab   : > { %597 = vmatprep.subr.bf16.mxu0 %v3177_v26  ;;  %638 = vmatprep.subr.bf16.mxu1 %v3179_v34  ;;  %v3183_v2 = vcombine.high %v380_v61, %v384_v62  ;;  %v3649_v3 = vld [vmem:[#allocation8 + $0x4] ss:$16 sps:$4 sm:$0xff]   ;;  %v3182_v4 = vcombine.low %v380_v61, %v384_v62  ;;  %v3647_v5 = vld [vmem:[#allocation8] ss:$16 sps:$4 sm:$0xff]   ;;  %v3662_v15 = vld [vmem:[#allocation8 + $0x48] ss:$16 sps:$4 sm:$0xff]  }
  0xac   : > { %v3655_v6 = vld [vmem:[#allocation8 + $0x24] ss:$16 sps:$4 sm:$0xff]   ;;  %v3653_v8 = vld [vmem:[#allocation8 + $0x20] ss:$16 sps:$4 sm:$0xff]   ;;  %v3670_v17 = vld [vmem:[#allocation8 + $0x6c] ss:$16 sps:$4 sm:$0xff]  }
  0xad   : > { %v3661_v10 = vld [vmem:[#allocation8 + $0x44] ss:$16 sps:$4 sm:$0xff]   ;;  %v3659_v12 = vld [vmem:[#allocation8 + $0x40] ss:$16 sps:$4 sm:$0xff]   ;;  %v3668_v19 = vld [vmem:[#allocation8 + $0x68] ss:$16 sps:$4 sm:$0xff]  }
  0xae   : > { %598 = vmatpush1.bf16.msra.mxu0 %v3176_v32  ;;  %639 = vmatpush1.bf16.msra.mxu1 %v3178_v41  ;;  %v3667_v14 = vld [vmem:[#allocation8 + $0x64] ss:$16 sps:$4 sm:$0xff]   ;;  %v3665_v16 = vld [vmem:[#allocation8 + $0x60] ss:$16 sps:$4 sm:$0xff]   ;;  %v3676_v21 = vld [vmem:[#allocation8 + $0x8c] ss:$16 sps:$4 sm:$0xff]  }
  0xaf   : > { %673 = vmatprep.subr.bf16.mxu0 %v3157_v35  ;;  %714 = vmatprep.subr.bf16.mxu1 %v3159_v44  ;;  %v3673_v18 = vld [vmem:[#allocation8 + $0x84] ss:$16 sps:$4 sm:$0xff]   ;;  %v3671_v20 = vld [vmem:[#allocation8 + $0x80] ss:$16 sps:$4 sm:$0xff]   ;;  %v3674_v23 = vld [vmem:[#allocation8 + $0x88] ss:$16 sps:$4 sm:$0xff]  }
  0xb0   : > { %v3679_v22 = vld [vmem:[#allocation8 + $0xa4] ss:$16 sps:$4 sm:$0xff]   ;;  %v3677_v24 = vld [vmem:[#allocation8 + $0xa0] ss:$16 sps:$4 sm:$0xff]   ;;  %v3682_v25 = vld [vmem:[#allocation8 + $0xac] ss:$16 sps:$4 sm:$0xff]  }
  0xb1   : > { %3184 = vmatmul.mubr.msk.bf16.vlgmr.msra.gmra.mrb[0].mxu0 %vm587_vm0, %v4572_v40  ;;  %3185 = vmatmul.mubr.msk.bf16.vlgmr.msra.gmra.mrb[0].mxu1 %vm587_vm0, %v4572_v40  ;;  %v3685_v26 = vld [vmem:[#allocation8 + $0xc4] ss:$16 sps:$4 sm:$0xff]   ;;  %v3680_v27 = vld [vmem:[#allocation8 + $0xa8] ss:$16 sps:$4 sm:$0xff]   ;;  %v3683_v28 = vld [vmem:[#allocation8 + $0xc0] ss:$16 sps:$4 sm:$0xff]  }
  0xb2   : > { %674 = vmatpush1.bf16.msra.mxu0 %v3156_v42  ;;  %705 = vmatprep.mubr.bf16.mxu0 %v4296_v0  ;;  %v3688_v29 = vld [vmem:[#allocation8 + $0xcc] ss:$16 sps:$4 sm:$0xff]   ;;  %v3691_v30 = vld [vmem:[#allocation8 + $0xe4] ss:$16 sps:$4 sm:$0xff]   ;;  %v3686_v31 = vld [vmem:[#allocation8 + $0xc8] ss:$16 sps:$4 sm:$0xff]  }
  0xb3   : > { %675 = vmatprep.subr.bf16.mxu0 %v3165_v43  ;;  %715 = vmatpush1.bf16.msra.mxu1 %v3158_v49  ;;  %v3689_v32 = vld [vmem:[#allocation8 + $0xe0] ss:$16 sps:$4 sm:$0xff]   ;;  %v3694_v33 = vld [vmem:[#allocation8 + $0xec] ss:$16 sps:$4 sm:$0xff]   ;;  %v3697_v34 = vld [vmem:[#allocation8 + $0x104] ss:$16 sps:$4 sm:$0xff]  }
  0xb4   : > { %746 = vmatprep.mubr.bf16.mxu1 %v4296_v0  ;;  %716 = vmatprep.subr.bf16.mxu1 %v3167_v51  ;;  %v3652_v0 = vld [vmem:[#allocation8 + $0xc] ss:$16 sps:$4 sm:$0xff]   ;;  %v3692_v35 = vld [vmem:[#allocation8 + $0xe8] ss:$16 sps:$4 sm:$0xff]   ;;  %v3695_v36 = vld [vmem:[#allocation8 + $0x100] ss:$16 sps:$4 sm:$0xff]  }
  0xb5   : > { %v3700_v37 = vld [vmem:[#allocation8 + $0x10c] ss:$16 sps:$4 sm:$0xff]   ;;  %v3703_v38 = vld [vmem:[#allocation8 + $0x124] ss:$16 sps:$4 sm:$0xff]   ;;  %v3698_v39 = vld [vmem:[#allocation8 + $0x108] ss:$16 sps:$4 sm:$0xff]  }
  0xb6   : > { %676 = vmatpush1.bf16.msra.mxu0 %v3164_v50  ;;  %v3706_v41 = vld [vmem:[#allocation8 + $0x12c] ss:$16 sps:$4 sm:$0xff]   ;;  %v3709_v42 = vld [vmem:[#allocation8 + $0x144] ss:$16 sps:$4 sm:$0xff]   ;;  %v3704_v43 = vld [vmem:[#allocation8 + $0x128] ss:$16 sps:$4 sm:$0xff]  }
  0xb7   : > { %677 = vmatprep.subr.bf16.mxu0 %v3173_v52  ;;  %717 = vmatpush1.bf16.msra.mxu1 %v3166_v57  ;;  %v3707_v44 = vld [vmem:[#allocation8 + $0x140] ss:$16 sps:$4 sm:$0xff]   ;;  %v3712_v45 = vld [vmem:[#allocation8 + $0x14c] ss:$16 sps:$4 sm:$0xff]   ;;  %v3715_v46 = vld [vmem:[#allocation8 + $0x164] ss:$16 sps:$4 sm:$0xff]  }
  0xb8   : > { %718 = vmatprep.subr.bf16.mxu1 %v3175_v59  ;;  %v3710_v47 = vld [vmem:[#allocation8 + $0x148] ss:$16 sps:$4 sm:$0xff]   ;;  %v3713_v48 = vld [vmem:[#allocation8 + $0x160] ss:$16 sps:$4 sm:$0xff]   ;;  %v3718_v49 = vld [vmem:[#allocation8 + $0x16c] ss:$16 sps:$4 sm:$0xff]  }
  0xb9   : > { %v3721_v50 = vld [vmem:[#allocation8 + $0x184] ss:$16 sps:$4 sm:$0xff]   ;;  %v3716_v51 = vld [vmem:[#allocation8 + $0x168] ss:$16 sps:$4 sm:$0xff]   ;;  %v3719_v52 = vld [vmem:[#allocation8 + $0x180] ss:$16 sps:$4 sm:$0xff]  }
  0xba   : > { %678 = vmatpush1.bf16.msra.mxu0 %v3172_v58  ;;  %v3724_v53 = vld [vmem:[#allocation8 + $0x18c] ss:$16 sps:$4 sm:$0xff]   ;;  %v3727_v54 = vld [vmem:[#allocation8 + $0x1a4] ss:$16 sps:$4 sm:$0xff]   ;;  %v3722_v55 = vld [vmem:[#allocation8 + $0x188] ss:$16 sps:$4 sm:$0xff]  }
  0xbb   : > { %679 = vmatprep.subr.bf16.mxu0 %v3181_v60  ;;  %719 = vmatpush1.bf16.msra.mxu1 %v3174_v63  ;;  %v3725_v56 = vld [vmem:[#allocation8 + $0x1a0] ss:$16 sps:$4 sm:$0xff]   ;;  %v3730_v57 = vld [vmem:[#allocation8 + $0x1ac] ss:$16 sps:$4 sm:$0xff]   ;;  %v3728_v58 = vld [vmem:[#allocation8 + $0x1a8] ss:$16 sps:$4 sm:$0xff]  }
  0xbc   : > { %720 = vmatprep.subr.bf16.mxu1 %v3183_v2  ;;  %v3733_v59 = vld [vmem:[#allocation8 + $0x1c4] ss:$16 sps:$4 sm:$0xff]   ;;  %v3736_v60 = vld [vmem:[#allocation8 + $0x1cc] ss:$16 sps:$4 sm:$0xff]   ;;  %v3731_v61 = vld [vmem:[#allocation8 + $0x1c0] ss:$16 sps:$4 sm:$0xff]  }
  0xbd   : > { %v3734_v62 = vld [vmem:[#allocation8 + $0x1c8] ss:$16 sps:$4 sm:$0xff]   ;;  %v3739_v63 = vld [vmem:[#allocation8 + $0x1e4] ss:$16 sps:$4 sm:$0xff]   ;;  %v3737_v2 = vld [vmem:[#allocation8 + $0x1e0] ss:$16 sps:$4 sm:$0xff]  }
  0xbe   : > { %680 = vmatpush1.bf16.msra.mxu0 %v3180_v1  ;;  %v3742_v1 = vld [vmem:[#allocation8 + $0x1ec] ss:$16 sps:$4 sm:$0xff]  }
  0xbf   : > { %2329 = vmatprep.subr.bf16.mxu0 %v3649_v3  ;;  %721 = vmatpush1.bf16.msra.mxu1 %v3182_v4  ;;  %v3740_v3 = vld [vmem:[#allocation8 + $0x1e8] ss:$16 sps:$4 sm:$0xff]   ;;  %v3745_v4 = vld [vmem:[#allocation8 + $0x204] ss:$16 sps:$4 sm:$0xff]  }
  0xc0   : > { %2493 = vmatprep.subr.bf16.mxu1 %v3652_v0  ;;  %v387_v0 = vlaneseq }
  0xc1   : > { %3186 = vmatmul.mubr.msk.bf16.vlgmr.msra.gmra.mrb[4].mxu0 %vm587_vm0, %v4572_v40 }
  0xc2   : > { %2330 = vmatpush1.bf16.msra.mxu0 %v3647_v5  ;;  %3187 = vmatmul.mubr.msk.bf16.vlgmr.msra.gmra.mrb[4].mxu1 %vm587_vm0, %v4572_v40  ;;  %v3701_v40 = vld [vmem:[#allocation8 + $0x120] ss:$16 sps:$4 sm:$0xff]   ;;  %v3748_v5 = vld [vmem:[#allocation8 + $0x20c] ss:$16 sps:$4 sm:$0xff]  }
  0xc3   : > { %2331 = vmatprep.subr.bf16.mxu0 %v3655_v6  ;;  %2494 = vmatpush1.bf16.msra.mxu1 %v3650_v7  ;;  %v4584_v6 = vshrl.u32 %v387_v0, 7  ;;  %v3793_v0 = vld [vmem:[#allocation8 + $0x304] ss:$16 sps:$4 sm:$0xff]  }
  0xc4   : > { %2495 = vmatprep.subr.bf16.mxu1 %v3658_v9 }
  0xc5   : > { %v389_v7 = vsub.s32 0, %v4584_v6  ;;  %v393_v9 = vsub.s32 1, %v4584_v6 }
  0xc6   : > { %2332 = vmatpush1.bf16.msra.mxu0 %v3653_v8  ;;  %v4587_v8 = vld [vmem:[#allocation7] sm:$0xff] }
  0xc7   : > { %2333 = vmatprep.subr.bf16.mxu0 %v3661_v10  ;;  %2496 = vmatpush1.bf16.msra.mxu1 %v3656_v11  ;;  %v390_v10 = vrot.slane %v4587_v8, %v389_v7  ;;  %v401_v11 = vsub.s32 3, %v4584_v6 }
  0xc8   : > { %2497 = vmatprep.subr.bf16.mxu1 %v3664_v13 }
  0xca   : > { %2334 = vmatpush1.bf16.msra.mxu0 %v3659_v12  ;;  %v394_v12 = vrot.slane %v4587_v8, %v393_v9 }
  0xcb   : > { %2335 = vmatprep.subr.bf16.mxu0 %v3667_v14  ;;  %2498 = vmatpush1.bf16.msra.mxu1 %v3662_v15 }
  0xcc   : > { %2499 = vmatprep.subr.bf16.mxu1 %v3670_v17 }
  0xce   : > { %2336 = vmatpush1.bf16.msra.mxu0 %v3665_v16  ;;  %v402_v16 = vrot.slane %v4587_v8, %v401_v11 }
  0xcf   : > { %2337 = vmatprep.subr.bf16.mxu0 %v3673_v18  ;;  %2500 = vmatpush1.bf16.msra.mxu1 %v3668_v19 }
  0xd0   : > { %2501 = vmatprep.subr.bf16.mxu1 %v3676_v21 }
  0xd2   : > { %2338 = vmatpush1.bf16.msra.mxu0 %v3671_v20 }
  0xd3   : > { %2339 = vmatprep.subr.bf16.mxu0 %v3679_v22  ;;  %2502 = vmatpush1.bf16.msra.mxu1 %v3674_v23 }
  0xd4   : > { %2503 = vmatprep.subr.bf16.mxu1 %v3682_v25 }
  0xd6   : > { %2340 = vmatpush1.bf16.msra.mxu0 %v3677_v24 }
  0xd7   : > { %2341 = vmatprep.subr.bf16.mxu0 %v3685_v26  ;;  %2504 = vmatpush1.bf16.msra.mxu1 %v3680_v27  ;;  %v3743_v27 = vld [vmem:[#allocation8 + $0x200] ss:$16 sps:$4 sm:$0xff]  }
  0xd8   : > { %2505 = vmatprep.subr.bf16.mxu1 %v3688_v29 }
  0xda   : > { %2342 = vmatpush1.bf16.msra.mxu0 %v3683_v28  ;;  %v3746_v28 = vld [vmem:[#allocation8 + $0x208] ss:$16 sps:$4 sm:$0xff]  }
  0xdb   : > { %2343 = vmatprep.subr.bf16.mxu0 %v3691_v30  ;;  %2506 = vmatpush1.bf16.msra.mxu1 %v3686_v31  ;;  %v3751_v31 = vld [vmem:[#allocation8 + $0x224] ss:$16 sps:$4 sm:$0xff]  }
  0xdc   : > { %2507 = vmatprep.subr.bf16.mxu1 %v3694_v33 }
  0xde   : > { %2344 = vmatpush1.bf16.msra.mxu0 %v3689_v32  ;;  %v3754_v32 = vld [vmem:[#allocation8 + $0x22c] ss:$16 sps:$4 sm:$0xff]  }
  0xdf   : > { %2345 = vmatprep.subr.bf16.mxu0 %v3697_v34  ;;  %2508 = vmatpush1.bf16.msra.mxu1 %v3692_v35  ;;  %v3749_v35 = vld [vmem:[#allocation8 + $0x220] ss:$16 sps:$4 sm:$0xff]  }
  0xe0   : > { %2509 = vmatprep.subr.bf16.mxu1 %v3700_v37  ;;  %v3757_v37 = vld [vmem:[#allocation8 + $0x244] ss:$16 sps:$4 sm:$0xff]  }
  0xe2   : > { %2346 = vmatpush1.bf16.msra.mxu0 %v3695_v36  ;;  %v3752_v36 = vld [vmem:[#allocation8 + $0x228] ss:$16 sps:$4 sm:$0xff]  }
  0xe3   : > { %2347 = vmatprep.subr.bf16.mxu0 %v3703_v38  ;;  %2510 = vmatpush1.bf16.msra.mxu1 %v3698_v39  ;;  %v3760_v38 = vld [vmem:[#allocation8 + $0x24c] ss:$16 sps:$4 sm:$0xff]   ;;  %v3755_v39 = vld [vmem:[#allocation8 + $0x240] ss:$16 sps:$4 sm:$0xff]  }
  0xe4   : > { %2511 = vmatprep.subr.bf16.mxu1 %v3706_v41  ;;  %v3763_v41 = vld [vmem:[#allocation8 + $0x264] ss:$16 sps:$4 sm:$0xff]  }
  0xe6   : > { %2348 = vmatpush1.bf16.msra.mxu0 %v3701_v40  ;;  %v3758_v40 = vld [vmem:[#allocation8 + $0x248] ss:$16 sps:$4 sm:$0xff]  }
  0xe7   : > { %2349 = vmatprep.subr.bf16.mxu0 %v3709_v42  ;;  %2512 = vmatpush1.bf16.msra.mxu1 %v3704_v43  ;;  %v3766_v42 = vld [vmem:[#allocation8 + $0x26c] ss:$16 sps:$4 sm:$0xff]  }
  0xe8   : > { %2513 = vmatprep.subr.bf16.mxu1 %v3712_v45  ;;  %v3761_v45 = vld [vmem:[#allocation8 + $0x260] ss:$16 sps:$4 sm:$0xff]  }
  0xea   : > { %2350 = vmatpush1.bf16.msra.mxu0 %v3707_v44 }
  0xeb   : > { %2351 = vmatprep.subr.bf16.mxu0 %v3715_v46  ;;  %2514 = vmatpush1.bf16.msra.mxu1 %v3710_v47  ;;  %v3764_v46 = vld [vmem:[#allocation8 + $0x268] ss:$16 sps:$4 sm:$0xff]  }
  0xec   : > { %2515 = vmatprep.subr.bf16.mxu1 %v3718_v49  ;;  %v3772_v49 = vld [vmem:[#allocation8 + $0x28c] ss:$16 sps:$4 sm:$0xff]  }
  0xee   : > { %2352 = vmatpush1.bf16.msra.mxu0 %v3713_v48  ;;  %v3769_v48 = vld [vmem:[#allocation8 + $0x284] ss:$16 sps:$4 sm:$0xff]  }
  0xef   : > { %2353 = vmatprep.subr.bf16.mxu0 %v3721_v50  ;;  %2516 = vmatpush1.bf16.msra.mxu1 %v3716_v51  ;;  %v3767_v51 = vld [vmem:[#allocation8 + $0x280] ss:$16 sps:$4 sm:$0xff]  }
  0xf0   : > { %2517 = vmatprep.subr.bf16.mxu1 %v3724_v53  ;;  %v3775_v53 = vld [vmem:[#allocation8 + $0x2a4] ss:$16 sps:$4 sm:$0xff]  }
  0xf2   : > { %2354 = vmatpush1.bf16.msra.mxu0 %v3719_v52  ;;  %v3770_v52 = vld [vmem:[#allocation8 + $0x288] ss:$16 sps:$4 sm:$0xff]  }
  0xf3   : > { %2355 = vmatprep.subr.bf16.mxu0 %v3727_v54  ;;  %2518 = vmatpush1.bf16.msra.mxu1 %v3722_v55  ;;  %v3778_v54 = vld [vmem:[#allocation8 + $0x2ac] ss:$16 sps:$4 sm:$0xff]   ;;  %v3773_v55 = vld [vmem:[#allocation8 + $0x2a0] ss:$16 sps:$4 sm:$0xff]  }
  0xf4   : > { %2519 = vmatprep.subr.bf16.mxu1 %v3730_v57 }
  0xf6   : > { %2356 = vmatpush1.bf16.msra.mxu0 %v3725_v56  ;;  %v3776_v56 = vld [vmem:[#allocation8 + $0x2a8] ss:$16 sps:$4 sm:$0xff]  }
  0xf7   : > { %2520 = vmatpush1.bf16.msra.mxu1 %v3728_v58  ;;  %2357 = vmatprep.subr.bf16.mxu0 %v3733_v59  ;;  %v3781_v58 = vld [vmem:[#allocation8 + $0x2c4] ss:$16 sps:$4 sm:$0xff]   ;;  %v3784_v59 = vld [vmem:[#allocation8 + $0x2cc] ss:$16 sps:$4 sm:$0xff]  }
  0xf8   : > { %2521 = vmatprep.subr.bf16.mxu1 %v3736_v60 }
  0xfa   : > { %2358 = vmatpush1.bf16.msra.mxu0 %v3731_v61 }
  0xfb   : > { %2522 = vmatpush1.bf16.msra.mxu1 %v3734_v62  ;;  %2359 = vmatprep.subr.bf16.mxu0 %v3739_v63  ;;  %v3779_v63 = vld [vmem:[#allocation8 + $0x2c0] ss:$16 sps:$4 sm:$0xff]  }
  0xfc   : > { %2523 = vmatprep.subr.bf16.mxu1 %v3742_v1  ;;  %v3782_v1 = vld [vmem:[#allocation8 + $0x2c8] ss:$16 sps:$4 sm:$0xff]  }
  0xfe   : > { %2360 = vmatpush1.bf16.msra.mxu0 %v3737_v2  ;;  %v3787_v2 = vld [vmem:[#allocation8 + $0x2e4] ss:$16 sps:$4 sm:$0xff]  }
  0xff   : > { %2524 = vmatpush1.bf16.msra.mxu1 %v3740_v3  ;;  %2370 = vmatprep.subr.bf16.mxu0 %v3745_v4  ;;  %v3790_v3 = vld [vmem:[#allocation8 + $0x2ec] ss:$16 sps:$4 sm:$0xff]   ;;  %v3785_v4 = vld [vmem:[#allocation8 + $0x2e0] ss:$16 sps:$4 sm:$0xff]  }
 0x100   : > { %2534 = vmatprep.subr.bf16.mxu1 %v3748_v5  ;;  %v3788_v5 = vld [vmem:[#allocation8 + $0x2e8] ss:$16 sps:$4 sm:$0xff]  }
 0x184   : > { %v625_v13 = vpop.f32.mrb[0].mxu0  ;;  %v4600_v21 = vpop.f32.mrb[0].mxu1 }
 0x185   : > { %v626_v14 = vadd.f32 %v625_v13, %v390_v10  ;;  %v627_v15 = vpop.f32.mrb[1].mxu0  ;;  %v668_v23 = vpop.f32.mrb[1].mxu1  ;;  %v3796_v10 = vld [vmem:[#allocation8 + $0x30c] ss:$16 sps:$4 sm:$0xff]   ;;  %v3794_v13 = vld [vmem:[#allocation8 + $0x308] ss:$16 sps:$4 sm:$0xff]  }
 0x186   : > { %v628_v17 = vadd.f32 %v627_v15, %v394_v12  ;;  %v629_v18 = vpop.f32.mrb[2].mxu0  ;;  %v669_v24 = vadd.f32 %v668_v23, %v402_v16  ;;  %v670_v25 = vpop.f32.mrb[2].mxu1  ;;  %v3791_v12 = vld [vmem:[#allocation8 + $0x300] ss:$16 sps:$4 sm:$0xff]   ;;  %v3802_v15 = vld [vmem:[#allocation8 + $0x32c] ss:$16 sps:$4 sm:$0xff]  }
 0x187   : > { %v755_v19 = vmax.f32 %v626_v14, 0.0  ;;  %v630_v20 = vpop.f32.mrb[3].mxu0  ;;  %v671_v29 = vpop.f32.mrb[3].mxu1  ;;  %v3799_v14 = vld [vmem:[#allocation8 + $0x324] ss:$16 sps:$4 sm:$0xff]  }
 0x188   : > { %v756_v22 = vmax.f32 %v628_v17, 0.0  ;;  %v758_v33 = vmax.f32 %v669_v24, 0.0  ;;  %v3797_v16 = vld [vmem:[#allocation8 + $0x320] ss:$16 sps:$4 sm:$0xff]   ;;  %v3800_v17 = vld [vmem:[#allocation8 + $0x328] ss:$16 sps:$4 sm:$0xff]  }
 0x189   : > { %v763_v30 = vpack.c.bf16 %v755_v19, %v755_v19  ;;  %v3805_v18 = vld [vmem:[#allocation8 + $0x344] ss:$16 sps:$4 sm:$0xff]   ;;  %v3808_v19 = vld [vmem:[#allocation8 + $0x34c] ss:$16 sps:$4 sm:$0xff]   ;;  %v3803_v20 = vld [vmem:[#allocation8 + $0x340] ss:$16 sps:$4 sm:$0xff]  }
 0x18a   : > { %v764_v26 = vpack.c.bf16 %v756_v22, %v756_v22  ;;  %v766_v34 = vpack.c.bf16 %v758_v33, %v758_v33  ;;  %v3806_v22 = vld [vmem:[#allocation8 + $0x348] ss:$16 sps:$4 sm:$0xff]   ;;  %v3811_v23 = vld [vmem:[#allocation8 + $0x364] ss:$16 sps:$4 sm:$0xff]   ;;  %v3814_v24 = vld [vmem:[#allocation8 + $0x36c] ss:$16 sps:$4 sm:$0xff]  }
 0x18b   : > { %v3809_v25 = vld [vmem:[#allocation8 + $0x360] ss:$16 sps:$4 sm:$0xff]   ;;  %v397_v29 = vsub.s32 2, %v4584_v6  ;;  %v3826_v33 = vld [vmem:[#allocation8 + $0x3ac] ss:$16 sps:$4 sm:$0xff]  }
 0x18c   : > { %2361 = vmatprep.mubr.bf16.mxu0 %v764_v26  ;;  %2525 = vmatprep.mubr.bf16.mxu1 %v764_v26  ;;  %v3812_v26 = vld [vmem:[#allocation8 + $0x368] ss:$16 sps:$4 sm:$0xff]  }
 0x18d   : > { %2362 = vmatmul.mubr.bf16.vlgmr.msra.gmra.mrb[8].mxu0 %v763_v30  ;;  %2526 = vmatmul.mubr.bf16.vlgmr.msra.gmra.mrb[8].mxu1 %v763_v30  ;;  %v3815_v30 = vld [vmem:[#allocation8 + $0x380] ss:$16 sps:$4 sm:$0xff]  }
 0x18e   : > { %2371 = vmatpush1.bf16.msra.mxu0 %v3743_v27  ;;  %2535 = vmatpush1.bf16.msra.mxu1 %v3746_v28  ;;  %v3817_v27 = vld [vmem:[#allocation8 + $0x384] ss:$16 sps:$4 sm:$0xff]   ;;  %v3820_v28 = vld [vmem:[#allocation8 + $0x38c] ss:$16 sps:$4 sm:$0xff]  }
 0x18f   : > { %2372 = vmatprep.subr.bf16.mxu0 %v3751_v31  ;;  %2536 = vmatprep.subr.bf16.mxu1 %v3754_v32  ;;  %v3818_v31 = vld [vmem:[#allocation8 + $0x388] ss:$16 sps:$4 sm:$0xff]   ;;  %v3823_v32 = vld [vmem:[#allocation8 + $0x3a4] ss:$16 sps:$4 sm:$0xff]  }
 0x190   : > { %2402 = vmatprep.mubr.bf16.mxu0 %v766_v34  ;;  %2566 = vmatprep.mubr.bf16.mxu1 %v766_v34  ;;  %v409_v34 = vsub.s32 5, %v4584_v6 }
 0x192   : > { %2373 = vmatpush1.bf16.msra.mxu0 %v3749_v35  ;;  %2537 = vmatpush1.bf16.msra.mxu1 %v3752_v36  ;;  %v398_v35 = vrot.slane %v4587_v8, %v397_v29  ;;  %v3821_v36 = vld [vmem:[#allocation8 + $0x3a0] ss:$16 sps:$4 sm:$0xff]  }
 0x193   : > { %2374 = vmatprep.subr.bf16.mxu0 %v3757_v37  ;;  %2538 = vmatprep.subr.bf16.mxu1 %v3760_v38  ;;  %v3824_v37 = vld [vmem:[#allocation8 + $0x3a8] ss:$16 sps:$4 sm:$0xff]   ;;  %v3829_v38 = vld [vmem:[#allocation8 + $0x3c4] ss:$16 sps:$4 sm:$0xff]  }
 0x194   : > { %v4602_v43 = vpop.f32.mrb[4].mxu0 }
 0x195   : > { %v4604_v44 = vpop.f32.mrb[5].mxu0  ;;  %v4606_v57 = vpop.f32.mrb[4].mxu1 }
 0x196   : > { %2375 = vmatpush1.bf16.msra.mxu0 %v3755_v39  ;;  %2539 = vmatpush1.bf16.msra.mxu1 %v3758_v40  ;;  %v711_v47 = vpop.f32.mrb[6].mxu0  ;;  %v4608_v60 = vpop.f32.mrb[5].mxu1  ;;  %v3832_v39 = vld [vmem:[#allocation8 + $0x3cc] ss:$16 sps:$4 sm:$0xff]   ;;  %v410_v40 = vrot.slane %v4587_v8, %v409_v34  ;;  %v3895_v34 = vld [vmem:[#allocation8 + $0x524] ss:$16 sps:$4 sm:$0xff]  }
 0x197   : > { %2376 = vmatprep.subr.bf16.mxu0 %v3763_v41  ;;  %2540 = vmatprep.subr.bf16.mxu1 %v3766_v42  ;;  %v712_v50 = vpop.f32.mrb[7].mxu0  ;;  %v752_v61 = vpop.f32.mrb[6].mxu1  ;;  %v667_v41 = vadd.f32 %v4600_v21, %v398_v35  ;;  %v3827_v42 = vld [vmem:[#allocation8 + $0x3c0] ss:$16 sps:$4 sm:$0xff]   ;;  %v3838_v47 = vld [vmem:[#allocation8 + $0x3ec] ss:$16 sps:$4 sm:$0xff]  }
 0x198   : > { %v753_v62 = vpop.f32.mrb[7].mxu1  ;;  %v3833_v50 = vld [vmem:[#allocation8 + $0x3e0] ss:$16 sps:$4 sm:$0xff]   ;;  %v3898_v35 = vld [vmem:[#allocation8 + $0x52c] ss:$16 sps:$4 sm:$0xff]  }
 0x199   : > { %v3845_v61 = vld [vmem:[#allocation8 + $0x420] ss:$16 sps:$4 sm:$0xff]   ;;  %v3848_v62 = vld [vmem:[#allocation8 + $0x428] ss:$16 sps:$4 sm:$0xff]  }
 0x19a   : > { %2377 = vmatpush1.bf16.msra.mxu0 %v3761_v45  ;;  %2541 = vmatpush1.bf16.msra.mxu1 %v3764_v46  ;;  %v3830_v45 = vld [vmem:[#allocation8 + $0x3c8] ss:$16 sps:$4 sm:$0xff]   ;;  %v3835_v46 = vld [vmem:[#allocation8 + $0x3e4] ss:$16 sps:$4 sm:$0xff]  }
 0x19b   : > { %2378 = vmatprep.subr.bf16.mxu0 %v3769_v48  ;;  %2542 = vmatprep.subr.bf16.mxu1 %v3772_v49  ;;  %v710_v48 = vadd.f32 %v4604_v44, %v410_v40  ;;  %v757_v49 = vmax.f32 %v667_v41, 0.0  ;;  %v3899_v40 = vld [vmem:[#allocation8 + $0x540] ss:$16 sps:$4 sm:$0xff]   ;;  %v3902_v41 = vld [vmem:[#allocation8 + $0x548] ss:$16 sps:$4 sm:$0xff]  }
 0x19d   : > { %v760_v21 = vmax.f32 %v710_v48, 0.0  ;;  %v3913_v48 = vld [vmem:[#allocation8 + $0x584] ss:$16 sps:$4 sm:$0xff]  }
 0x19e   : > { %2379 = vmatpush1.bf16.msra.mxu0 %v3767_v51  ;;  %2543 = vmatpush1.bf16.msra.mxu1 %v3770_v52  ;;  %v3836_v51 = vld [vmem:[#allocation8 + $0x3e8] ss:$16 sps:$4 sm:$0xff]   ;;  %v3841_v52 = vld [vmem:[#allocation8 + $0x404] ss:$16 sps:$4 sm:$0xff]  }
 0x19f   : > { %2380 = vmatprep.subr.bf16.mxu0 %v3775_v53  ;;  %2544 = vmatprep.subr.bf16.mxu1 %v3778_v54  ;;  %v3844_v53 = vld [vmem:[#allocation8 + $0x40c] ss:$16 sps:$4 sm:$0xff]   ;;  %v765_v54 = vpack.c.bf16 %v757_v49, %v757_v49  ;;  %v768_v44 = vpack.c.bf16 %v760_v21, %v760_v21 }
 0x1a0   : > { %v3916_v49 = vld [vmem:[#allocation8 + $0x58c] ss:$16 sps:$4 sm:$0xff]  }
 0x1a1   : > { %v3922_v21 = vld [vmem:[#allocation8 + $0x5ac] ss:$16 sps:$4 sm:$0xff]  }
 0x1a2   : > { %2381 = vmatpush1.bf16.msra.mxu0 %v3773_v55  ;;  %2545 = vmatpush1.bf16.msra.mxu1 %v3776_v56  ;;  %v3839_v55 = vld [vmem:[#allocation8 + $0x400] ss:$16 sps:$4 sm:$0xff]   ;;  %v3842_v56 = vld [vmem:[#allocation8 + $0x408] ss:$16 sps:$4 sm:$0xff]  }
 0x1a3   : > { %2382 = vmatprep.subr.bf16.mxu0 %v3781_v58  ;;  %2546 = vmatprep.subr.bf16.mxu1 %v3784_v59  ;;  %v3847_v58 = vld [vmem:[#allocation8 + $0x424] ss:$16 sps:$4 sm:$0xff]   ;;  %v3850_v59 = vld [vmem:[#allocation8 + $0x42c] ss:$16 sps:$4 sm:$0xff]  }
 0x1a6   : > { %2383 = vmatpush1.bf16.msra.mxu0 %v3779_v63  ;;  %2547 = vmatpush1.bf16.msra.mxu1 %v3782_v1  ;;  %v3853_v63 = vld [vmem:[#allocation8 + $0x444] ss:$16 sps:$4 sm:$0xff]   ;;  %v3856_v1 = vld [vmem:[#allocation8 + $0x44c] ss:$16 sps:$4 sm:$0xff]  }
 0x1a7   : > { %2384 = vmatprep.subr.bf16.mxu0 %v3787_v2  ;;  %2548 = vmatprep.subr.bf16.mxu1 %v3790_v3  ;;  %v3851_v2 = vld [vmem:[#allocation8 + $0x440] ss:$16 sps:$4 sm:$0xff]   ;;  %v3854_v3 = vld [vmem:[#allocation8 + $0x448] ss:$16 sps:$4 sm:$0xff]  }
 0x1aa   : > { %2385 = vmatpush1.bf16.msra.mxu0 %v3785_v4  ;;  %2549 = vmatpush1.bf16.msra.mxu1 %v3788_v5  ;;  %v3859_v4 = vld [vmem:[#allocation8 + $0x464] ss:$16 sps:$4 sm:$0xff]   ;;  %v3862_v5 = vld [vmem:[#allocation8 + $0x46c] ss:$16 sps:$4 sm:$0xff]  }
 0x1ab   : > { %2386 = vmatprep.subr.bf16.mxu0 %v3793_v0  ;;  %2550 = vmatprep.subr.bf16.mxu1 %v3796_v10  ;;  %v3857_v0 = vld [vmem:[#allocation8 + $0x460] ss:$16 sps:$4 sm:$0xff]   ;;  %v3860_v10 = vld [vmem:[#allocation8 + $0x468] ss:$16 sps:$4 sm:$0xff]  }
 0x1ae   : > { %2387 = vmatpush1.bf16.msra.mxu0 %v3791_v12  ;;  %2551 = vmatpush1.bf16.msra.mxu1 %v3794_v13  ;;  %v3865_v12 = vld [vmem:[#allocation8 + $0x484] ss:$16 sps:$4 sm:$0xff]   ;;  %v3868_v13 = vld [vmem:[#allocation8 + $0x48c] ss:$16 sps:$4 sm:$0xff]  }
 0x1af   : > { %2388 = vmatprep.subr.bf16.mxu0 %v3799_v14  ;;  %2552 = vmatprep.subr.bf16.mxu1 %v3802_v15  ;;  %v3863_v14 = vld [vmem:[#allocation8 + $0x480] ss:$16 sps:$4 sm:$0xff]   ;;  %v3866_v15 = vld [vmem:[#allocation8 + $0x488] ss:$16 sps:$4 sm:$0xff]  }
 0x1b2   : > { %2389 = vmatpush1.bf16.msra.mxu0 %v3797_v16  ;;  %2553 = vmatpush1.bf16.msra.mxu1 %v3800_v17  ;;  %v3871_v16 = vld [vmem:[#allocation8 + $0x4a4] ss:$16 sps:$4 sm:$0xff]   ;;  %v3874_v17 = vld [vmem:[#allocation8 + $0x4ac] ss:$16 sps:$4 sm:$0xff]  }
 0x1b3   : > { %2390 = vmatprep.subr.bf16.mxu0 %v3805_v18  ;;  %2554 = vmatprep.subr.bf16.mxu1 %v3808_v19  ;;  %v3869_v18 = vld [vmem:[#allocation8 + $0x4a0] ss:$16 sps:$4 sm:$0xff]   ;;  %v3872_v19 = vld [vmem:[#allocation8 + $0x4a8] ss:$16 sps:$4 sm:$0xff]  }
 0x1b6   : > { %2391 = vmatpush1.bf16.msra.mxu0 %v3803_v20  ;;  %2555 = vmatpush1.bf16.msra.mxu1 %v3806_v22  ;;  %v3877_v20 = vld [vmem:[#allocation8 + $0x4c4] ss:$16 sps:$4 sm:$0xff]   ;;  %v3880_v22 = vld [vmem:[#allocation8 + $0x4cc] ss:$16 sps:$4 sm:$0xff]  }
 0x1b7   : > { %2392 = vmatprep.subr.bf16.mxu0 %v3811_v23  ;;  %2556 = vmatprep.subr.bf16.mxu1 %v3814_v24  ;;  %v3875_v23 = vld [vmem:[#allocation8 + $0x4c0] ss:$16 sps:$4 sm:$0xff]   ;;  %v3878_v24 = vld [vmem:[#allocation8 + $0x4c8] ss:$16 sps:$4 sm:$0xff]  }
 0x1ba   : > { %2393 = vmatpush1.bf16.msra.mxu0 %v3809_v25  ;;  %2557 = vmatpush1.bf16.msra.mxu1 %v3812_v26  ;;  %v3883_v25 = vld [vmem:[#allocation8 + $0x4e4] ss:$16 sps:$4 sm:$0xff]   ;;  %v3886_v26 = vld [vmem:[#allocation8 + $0x4ec] ss:$16 sps:$4 sm:$0xff]  }
 0x1bb   : > { %2394 = vmatprep.subr.bf16.mxu0 %v3817_v27  ;;  %2558 = vmatprep.subr.bf16.mxu1 %v3820_v28  ;;  %v3881_v27 = vld [vmem:[#allocation8 + $0x4e0] ss:$16 sps:$4 sm:$0xff]   ;;  %v3884_v28 = vld [vmem:[#allocation8 + $0x4e8] ss:$16 sps:$4 sm:$0xff]  }
 0x1be   : > { %2395 = vmatpush1.bf16.msra.mxu0 %v3815_v30  ;;  %2559 = vmatpush1.bf16.msra.mxu1 %v3818_v31  ;;  %v3889_v30 = vld [vmem:[#allocation8 + $0x504] ss:$16 sps:$4 sm:$0xff]   ;;  %v3892_v31 = vld [vmem:[#allocation8 + $0x50c] ss:$16 sps:$4 sm:$0xff]  }
 0x1bf   : > { %2396 = vmatprep.subr.bf16.mxu0 %v3823_v32  ;;  %2560 = vmatprep.subr.bf16.mxu1 %v3826_v33  ;;  %v3887_v32 = vld [vmem:[#allocation8 + $0x500] ss:$16 sps:$4 sm:$0xff]   ;;  %v3890_v33 = vld [vmem:[#allocation8 + $0x508] ss:$16 sps:$4 sm:$0xff]  }
 0x1c2   : > { %2397 = vmatpush1.bf16.msra.mxu0 %v3821_v36  ;;  %2561 = vmatpush1.bf16.msra.mxu1 %v3824_v37  ;;  %v3893_v36 = vld [vmem:[#allocation8 + $0x520] ss:$16 sps:$4 sm:$0xff]   ;;  %v3896_v37 = vld [vmem:[#allocation8 + $0x528] ss:$16 sps:$4 sm:$0xff]  }
 0x1c3   : > { %2398 = vmatprep.subr.bf16.mxu0 %v3829_v38  ;;  %2562 = vmatprep.subr.bf16.mxu1 %v3832_v39  ;;  %v3901_v38 = vld [vmem:[#allocation8 + $0x544] ss:$16 sps:$4 sm:$0xff]   ;;  %v3904_v39 = vld [vmem:[#allocation8 + $0x54c] ss:$16 sps:$4 sm:$0xff]  }
 0x1c6   : > { %2399 = vmatpush1.bf16.msra.mxu0 %v3827_v42  ;;  %2563 = vmatpush1.bf16.msra.mxu1 %v3830_v45  ;;  %v3907_v42 = vld [vmem:[#allocation8 + $0x564] ss:$16 sps:$4 sm:$0xff]   ;;  %v3910_v45 = vld [vmem:[#allocation8 + $0x56c] ss:$16 sps:$4 sm:$0xff]  }
 0x1c7   : > { %2400 = vmatprep.subr.bf16.mxu0 %v3835_v46  ;;  %2564 = vmatprep.subr.bf16.mxu1 %v3838_v47  ;;  %v3905_v46 = vld [vmem:[#allocation8 + $0x560] ss:$16 sps:$4 sm:$0xff]   ;;  %v3908_v47 = vld [vmem:[#allocation8 + $0x568] ss:$16 sps:$4 sm:$0xff]  }
 0x1ca   : > { %2401 = vmatpush1.bf16.msra.mxu0 %v3833_v50  ;;  %2565 = vmatpush1.bf16.msra.mxu1 %v3836_v51  ;;  %v405_v50 = vsub.s32 4, %v4584_v6  ;;  %v3911_v51 = vld [vmem:[#allocation8 + $0x580] ss:$16 sps:$4 sm:$0xff]  }
 0x1cb   : > { %2411 = vmatprep.subr.bf16.mxu0 %v3841_v52  ;;  %2575 = vmatprep.subr.bf16.mxu1 %v3844_v53  ;;  %v3914_v52 = vld [vmem:[#allocation8 + $0x588] ss:$16 sps:$4 sm:$0xff]   ;;  %v3919_v53 = vld [vmem:[#allocation8 + $0x5a4] ss:$16 sps:$4 sm:$0xff]  }
 0x1cd   : > { %2403 = vmatmul.mubr.bf16.vlgmr.msra.gmra.mrb[8].mxu0 %v765_v54  ;;  %2567 = vmatmul.mubr.bf16.vlgmr.msra.gmra.mrb[8].mxu1 %v765_v54  ;;  %v417_v54 = vsub.s32 7, %v4584_v6 }
 0x1ce   : > { %2412 = vmatpush1.bf16.msra.mxu0 %v3839_v55  ;;  %2576 = vmatpush1.bf16.msra.mxu1 %v3842_v56  ;;  %v406_v55 = vrot.slane %v4587_v8, %v405_v50  ;;  %v3917_v56 = vld [vmem:[#allocation8 + $0x5a0] ss:$16 sps:$4 sm:$0xff]   ;;  %v3988_v50 = vld [vmem:[#allocation8 + $0x70c] ss:$16 sps:$4 sm:$0xff]  }
 0x1cf   : > { %2413 = vmatprep.subr.bf16.mxu0 %v3847_v58  ;;  %2577 = vmatprep.subr.bf16.mxu1 %v3850_v59  ;;  %v3920_v58 = vld [vmem:[#allocation8 + $0x5a8] ss:$16 sps:$4 sm:$0xff]   ;;  %v3925_v59 = vld [vmem:[#allocation8 + $0x5c4] ss:$16 sps:$4 sm:$0xff]  }
 0x1d0   : > { %2443 = vmatprep.mubr.bf16.mxu0 %v768_v44  ;;  %2607 = vmatprep.mubr.bf16.mxu1 %v768_v44  ;;  %v3928_v44 = vld [vmem:[#allocation8 + $0x5cc] ss:$16 sps:$4 sm:$0xff]  }
 0x1d2   : > { %2414 = vmatpush1.bf16.msra.mxu0 %v3845_v61  ;;  %2578 = vmatpush1.bf16.msra.mxu1 %v3848_v62  ;;  %v418_v61 = vrot.slane %v4587_v8, %v417_v54  ;;  %v708_v62 = vadd.f32 %v4602_v43, %v406_v55  ;;  %v3989_v54 = vld [vmem:[#allocation8 + $0x720] ss:$16 sps:$4 sm:$0xff]   ;;  %v3992_v55 = vld [vmem:[#allocation8 + $0x728] ss:$16 sps:$4 sm:$0xff]  }
 0x1d3   : > { %2415 = vmatprep.subr.bf16.mxu0 %v3853_v63  ;;  %2579 = vmatprep.subr.bf16.mxu1 %v3856_v1  ;;  %v3923_v63 = vld [vmem:[#allocation8 + $0x5c0] ss:$16 sps:$4 sm:$0xff]   ;;  %v3926_v1 = vld [vmem:[#allocation8 + $0x5c8] ss:$16 sps:$4 sm:$0xff]  }
 0x1d6   : > { %2416 = vmatpush1.bf16.msra.mxu0 %v3851_v2  ;;  %2580 = vmatpush1.bf16.msra.mxu1 %v3854_v3  ;;  %v3931_v2 = vld [vmem:[#allocation8 + $0x5e4] ss:$16 sps:$4 sm:$0xff]   ;;  %v3934_v3 = vld [vmem:[#allocation8 + $0x5ec] ss:$16 sps:$4 sm:$0xff]  }
 0x1d7   : > { %2417 = vmatprep.subr.bf16.mxu0 %v3859_v4  ;;  %2581 = vmatprep.subr.bf16.mxu1 %v3862_v5  ;;  %v751_v4 = vadd.f32 %v4608_v60, %v418_v61  ;;  %v759_v5 = vmax.f32 %v708_v62, 0.0  ;;  %v4003_v61 = vld [vmem:[#allocation8 + $0x764] ss:$16 sps:$4 sm:$0xff]   ;;  %v4006_v62 = vld [vmem:[#allocation8 + $0x76c] ss:$16 sps:$4 sm:$0xff]  }
 0x1d9   : > { %v762_v43 = vmax.f32 %v751_v4, 0.0  ;;  %v4007_v4 = vld [vmem:[#allocation8 + $0x780] ss:$16 sps:$4 sm:$0xff]  }
 0x1da   : > { %2418 = vmatpush1.bf16.msra.mxu0 %v3857_v0  ;;  %2582 = vmatpush1.bf16.msra.mxu1 %v3860_v10  ;;  %v3929_v0 = vld [vmem:[#allocation8 + $0x5e0] ss:$16 sps:$4 sm:$0xff]   ;;  %v3932_v10 = vld [vmem:[#allocation8 + $0x5e8] ss:$16 sps:$4 sm:$0xff]  }
 0x1db   : > { %2419 = vmatprep.subr.bf16.mxu0 %v3865_v12  ;;  %2583 = vmatprep.subr.bf16.mxu1 %v3868_v13  ;;  %v3937_v12 = vld [vmem:[#allocation8 + $0x604] ss:$16 sps:$4 sm:$0xff]   ;;  %v3940_v13 = vld [vmem:[#allocation8 + $0x60c] ss:$16 sps:$4 sm:$0xff]   ;;  %v770_v60 = vpack.c.bf16 %v762_v43, %v762_v43  ;;  %v4016_v43 = vld [vmem:[#allocation8 + $0x7a8] ss:$16 sps:$4 sm:$0xff]  }
 0x1de   : > { %2420 = vmatpush1.bf16.msra.mxu0 %v3863_v14  ;;  %2584 = vmatpush1.bf16.msra.mxu1 %v3866_v15  ;;  %v767_v14 = vpack.c.bf16 %v759_v5, %v759_v5  ;;  %v3935_v15 = vld [vmem:[#allocation8 + $0x600] ss:$16 sps:$4 sm:$0xff]   ;;  %v4010_v5 = vld [vmem:[#allocation8 + $0x788] ss:$16 sps:$4 sm:$0xff]  }
 0x1df   : > { %2421 = vmatprep.subr.bf16.mxu0 %v3871_v16  ;;  %2585 = vmatprep.subr.bf16.mxu1 %v3874_v17  ;;  %v3938_v16 = vld [vmem:[#allocation8 + $0x608] ss:$16 sps:$4 sm:$0xff]   ;;  %v3943_v17 = vld [vmem:[#allocation8 + $0x624] ss:$16 sps:$4 sm:$0xff]  }
 0x1e2   : > { %2422 = vmatpush1.bf16.msra.mxu0 %v3869_v18  ;;  %2586 = vmatpush1.bf16.msra.mxu1 %v3872_v19  ;;  %v3946_v18 = vld [vmem:[#allocation8 + $0x62c] ss:$16 sps:$4 sm:$0xff]   ;;  %v3941_v19 = vld [vmem:[#allocation8 + $0x620] ss:$16 sps:$4 sm:$0xff]  }
 0x1e3   : > { %2423 = vmatprep.subr.bf16.mxu0 %v3877_v20  ;;  %2587 = vmatprep.subr.bf16.mxu1 %v3880_v22  ;;  %v3944_v20 = vld [vmem:[#allocation8 + $0x628] ss:$16 sps:$4 sm:$0xff]   ;;  %v3949_v22 = vld [vmem:[#allocation8 + $0x644] ss:$16 sps:$4 sm:$0xff]  }
 0x1e6   : > { %2424 = vmatpush1.bf16.msra.mxu0 %v3875_v23  ;;  %2588 = vmatpush1.bf16.msra.mxu1 %v3878_v24  ;;  %v3952_v23 = vld [vmem:[#allocation8 + $0x64c] ss:$16 sps:$4 sm:$0xff]   ;;  %v3947_v24 = vld [vmem:[#allocation8 + $0x640] ss:$16 sps:$4 sm:$0xff]  }
 0x1e7   : > { %2425 = vmatprep.subr.bf16.mxu0 %v3883_v25  ;;  %2589 = vmatprep.subr.bf16.mxu1 %v3886_v26  ;;  %v3950_v25 = vld [vmem:[#allocation8 + $0x648] ss:$16 sps:$4 sm:$0xff]   ;;  %v3955_v26 = vld [vmem:[#allocation8 + $0x664] ss:$16 sps:$4 sm:$0xff]  }
 0x1ea   : > { %2426 = vmatpush1.bf16.msra.mxu0 %v3881_v27  ;;  %2590 = vmatpush1.bf16.msra.mxu1 %v3884_v28  ;;  %v3958_v27 = vld [vmem:[#allocation8 + $0x66c] ss:$16 sps:$4 sm:$0xff]   ;;  %v3953_v28 = vld [vmem:[#allocation8 + $0x660] ss:$16 sps:$4 sm:$0xff]  }
 0x1eb   : > { %2427 = vmatprep.subr.bf16.mxu0 %v3889_v30  ;;  %2591 = vmatprep.subr.bf16.mxu1 %v3892_v31  ;;  %v3956_v30 = vld [vmem:[#allocation8 + $0x668] ss:$16 sps:$4 sm:$0xff]   ;;  %v3961_v31 = vld [vmem:[#allocation8 + $0x684] ss:$16 sps:$4 sm:$0xff]  }
 0x1ee   : > { %2428 = vmatpush1.bf16.msra.mxu0 %v3887_v32  ;;  %2592 = vmatpush1.bf16.msra.mxu1 %v3890_v33  ;;  %v3964_v32 = vld [vmem:[#allocation8 + $0x68c] ss:$16 sps:$4 sm:$0xff]   ;;  %v3959_v33 = vld [vmem:[#allocation8 + $0x680] ss:$16 sps:$4 sm:$0xff]  }
 0x1ef   : > { %2429 = vmatprep.subr.bf16.mxu0 %v3895_v34  ;;  %2593 = vmatprep.subr.bf16.mxu1 %v3898_v35  ;;  %v3962_v34 = vld [vmem:[#allocation8 + $0x688] ss:$16 sps:$4 sm:$0xff]   ;;  %v3967_v35 = vld [vmem:[#allocation8 + $0x6a4] ss:$16 sps:$4 sm:$0xff]  }
 0x1f2   : > { %2430 = vmatpush1.bf16.msra.mxu0 %v3893_v36  ;;  %2594 = vmatpush1.bf16.msra.mxu1 %v3896_v37  ;;  %v3970_v36 = vld [vmem:[#allocation8 + $0x6ac] ss:$16 sps:$4 sm:$0xff]   ;;  %v3965_v37 = vld [vmem:[#allocation8 + $0x6a0] ss:$16 sps:$4 sm:$0xff]  }
 0x1f3   : > { %2431 = vmatprep.subr.bf16.mxu0 %v3901_v38  ;;  %2595 = vmatprep.subr.bf16.mxu1 %v3904_v39  ;;  %v3968_v38 = vld [vmem:[#allocation8 + $0x6a8] ss:$16 sps:$4 sm:$0xff]   ;;  %v3973_v39 = vld [vmem:[#allocation8 + $0x6c4] ss:$16 sps:$4 sm:$0xff]  }
 0x1f6   : > { %2432 = vmatpush1.bf16.msra.mxu0 %v3899_v40  ;;  %2596 = vmatpush1.bf16.msra.mxu1 %v3902_v41  ;;  %v3976_v40 = vld [vmem:[#allocation8 + $0x6cc] ss:$16 sps:$4 sm:$0xff]   ;;  %v3971_v41 = vld [vmem:[#allocation8 + $0x6c0] ss:$16 sps:$4 sm:$0xff]  }
 0x1f7   : > { %2433 = vmatprep.subr.bf16.mxu0 %v3907_v42  ;;  %2597 = vmatprep.subr.bf16.mxu1 %v3910_v45  ;;  %v3974_v42 = vld [vmem:[#allocation8 + $0x6c8] ss:$16 sps:$4 sm:$0xff]   ;;  %v3979_v45 = vld [vmem:[#allocation8 + $0x6e4] ss:$16 sps:$4 sm:$0xff]  }
 0x1fa   : > { %2434 = vmatpush1.bf16.msra.mxu0 %v3905_v46  ;;  %2598 = vmatpush1.bf16.msra.mxu1 %v3908_v47  ;;  %v3982_v46 = vld [vmem:[#allocation8 + $0x6ec] ss:$16 sps:$4 sm:$0xff]   ;;  %v3977_v47 = vld [vmem:[#allocation8 + $0x6e0] ss:$16 sps:$4 sm:$0xff]  }
 0x1fb   : > { %2435 = vmatprep.subr.bf16.mxu0 %v3913_v48  ;;  %2599 = vmatprep.subr.bf16.mxu1 %v3916_v49  ;;  %v3980_v48 = vld [vmem:[#allocation8 + $0x6e8] ss:$16 sps:$4 sm:$0xff]   ;;  %v3985_v49 = vld [vmem:[#allocation8 + $0x704] ss:$16 sps:$4 sm:$0xff]  }
 0x1fe   : > { %2436 = vmatpush1.bf16.msra.mxu0 %v3911_v51  ;;  %2600 = vmatpush1.bf16.msra.mxu1 %v3914_v52  ;;  %v3983_v51 = vld [vmem:[#allocation8 + $0x700] ss:$16 sps:$4 sm:$0xff]   ;;  %v3986_v52 = vld [vmem:[#allocation8 + $0x708] ss:$16 sps:$4 sm:$0xff]  }
 0x1ff   : > { %2437 = vmatprep.subr.bf16.mxu0 %v3919_v53  ;;  %2601 = vmatprep.subr.bf16.mxu1 %v3922_v21  ;;  %v3991_v53 = vld [vmem:[#allocation8 + $0x724] ss:$16 sps:$4 sm:$0xff]   ;;  %v3994_v21 = vld [vmem:[#allocation8 + $0x72c] ss:$16 sps:$4 sm:$0xff]  }
 0x202   : > { %2438 = vmatpush1.bf16.msra.mxu0 %v3917_v56  ;;  %2602 = vmatpush1.bf16.msra.mxu1 %v3920_v58  ;;  %v3997_v56 = vld [vmem:[#allocation8 + $0x744] ss:$16 sps:$4 sm:$0xff]   ;;  %v4000_v58 = vld [vmem:[#allocation8 + $0x74c] ss:$16 sps:$4 sm:$0xff]  }
 0x203   : > { %2439 = vmatprep.subr.bf16.mxu0 %v3925_v59  ;;  %2603 = vmatprep.subr.bf16.mxu1 %v3928_v44  ;;  %v3995_v59 = vld [vmem:[#allocation8 + $0x740] ss:$16 sps:$4 sm:$0xff]   ;;  %v3998_v44 = vld [vmem:[#allocation8 + $0x748] ss:$16 sps:$4 sm:$0xff]  }
 0x206   : > { %2440 = vmatpush1.bf16.msra.mxu0 %v3923_v63  ;;  %2604 = vmatpush1.bf16.msra.mxu1 %v3926_v1  ;;  %v4001_v63 = vld [vmem:[#allocation8 + $0x760] ss:$16 sps:$4 sm:$0xff]   ;;  %v4004_v1 = vld [vmem:[#allocation8 + $0x768] ss:$16 sps:$4 sm:$0xff]  }
 0x207   : > { %2441 = vmatprep.subr.bf16.mxu0 %v3931_v2  ;;  %2605 = vmatprep.subr.bf16.mxu1 %v3934_v3  ;;  %v4009_v2 = vld [vmem:[#allocation8 + $0x784] ss:$16 sps:$4 sm:$0xff]   ;;  %v4012_v3 = vld [vmem:[#allocation8 + $0x78c] ss:$16 sps:$4 sm:$0xff]  }
 0x20a   : > { %2442 = vmatpush1.bf16.msra.mxu0 %v3929_v0  ;;  %2606 = vmatpush1.bf16.msra.mxu1 %v3932_v10  ;;  %v413_v0 = vsub.s32 6, %v4584_v6  ;;  %v4015_v10 = vld [vmem:[#allocation8 + $0x7a4] ss:$16 sps:$4 sm:$0xff]  }
 0x20b   : > { %2452 = vmatprep.subr.bf16.mxu0 %v3937_v12  ;;  %2616 = vmatprep.subr.bf16.mxu1 %v3940_v13  ;;  %v4018_v12 = vld [vmem:[#allocation8 + $0x7ac] ss:$16 sps:$4 sm:$0xff]   ;;  %v4013_v13 = vld [vmem:[#allocation8 + $0x7a0] ss:$16 sps:$4 sm:$0xff]  }
 0x20d   : > { %2444 = vmatmul.mubr.bf16.vlgmr.msra.gmra.mrb[8].mxu0 %v767_v14  ;;  %2608 = vmatmul.mubr.bf16.vlgmr.msra.gmra.mrb[8].mxu1 %v767_v14  ;;  %v414_v14 = vrot.slane %v4587_v8, %v413_v0  ;;  %v4031_v8 = vld [vmem:[#allocation10 + $0x40] sm:$0xff]  }
 0x20e   : > { %2453 = vmatpush1.bf16.msra.mxu0 %v3935_v15  ;;  %2617 = vmatpush1.bf16.msra.mxu1 %v3938_v16  ;;  %v4021_v15 = vld [vmem:[#allocation8 + $0x7c4] ss:$16 sps:$4 sm:$0xff]   ;;  %v4024_v16 = vld [vmem:[#allocation8 + $0x7cc] ss:$16 sps:$4 sm:$0xff]  }
 0x20f   : > { %2454 = vmatprep.subr.bf16.mxu0 %v3943_v17  ;;  %2618 = vmatprep.subr.bf16.mxu1 %v3946_v18  ;;  %v4019_v17 = vld [vmem:[#allocation8 + $0x7c0] ss:$16 sps:$4 sm:$0xff]   ;;  %v4022_v18 = vld [vmem:[#allocation8 + $0x7c8] ss:$16 sps:$4 sm:$0xff]  }
 0x210   : > { %2484 = vmatprep.mubr.bf16.mxu0 %v770_v60  ;;  %2648 = vmatprep.mubr.bf16.mxu1 %v770_v60  ;;  %v749_v60 = vadd.f32 %v4606_v57, %v414_v14  ;;  %v4035_v57 = vld [vmem:[#allocation10 + $0x48] sm:$0xff]  }
 0x212   : > { %2455 = vmatpush1.bf16.msra.mxu0 %v3941_v19  ;;  %2619 = vmatpush1.bf16.msra.mxu1 %v3944_v20  ;;  %v4027_v19 = vld [vmem:[#allocation8 + $0x7e4] ss:$16 sps:$4 sm:$0xff]   ;;  %v4030_v20 = vld [vmem:[#allocation8 + $0x7ec] ss:$16 sps:$4 sm:$0xff]  }
 0x213   : > { %2456 = vmatprep.subr.bf16.mxu0 %v3949_v22  ;;  %2620 = vmatprep.subr.bf16.mxu1 %v3952_v23  ;;  %v4025_v22 = vld [vmem:[#allocation8 + $0x7e0] ss:$16 sps:$4 sm:$0xff]   ;;  %v4028_v23 = vld [vmem:[#allocation8 + $0x7e8] ss:$16 sps:$4 sm:$0xff]  }
 0x216   : > { %2457 = vmatpush1.bf16.msra.mxu0 %v3947_v24  ;;  %2621 = vmatpush1.bf16.msra.mxu1 %v3950_v25  ;;  %v761_v24 = vmax.f32 %v749_v60, 0.0  ;;  %v4032_v25 = vld [vmem:[#allocation10 + $0xc0] sm:$0xff]  }
 0x217   : > { %2458 = vmatprep.subr.bf16.mxu0 %v3955_v26  ;;  %2622 = vmatprep.subr.bf16.mxu1 %v3958_v27  ;;  %v4033_v26 = vld [vmem:[#allocation10] sm:$0xff]  }
 0x218   : > { %v4034_v27 = vld [vmem:[#allocation10 + $0x80] sm:$0xff]  }
 0x21a   : > { %2459 = vmatpush1.bf16.msra.mxu0 %v3953_v28  ;;  %2623 = vmatpush1.bf16.msra.mxu1 %v3956_v30  ;;  %v769_v28 = vpack.c.bf16 %v761_v24, %v761_v24  ;;  %v4036_v30 = vld [vmem:[#allocation10 + $0xc8] sm:$0xff]  }
 0x21b   : > { %2460 = vmatprep.subr.bf16.mxu0 %v3961_v31  ;;  %2624 = vmatprep.subr.bf16.mxu1 %v3964_v32  ;;  %v4037_v31 = vld [vmem:[#allocation10 + $0x8] sm:$0xff]  }
 0x21c   : > { %v4038_v32 = vld [vmem:[#allocation10 + $0x88] sm:$0xff]  }
 0x21e   : > { %2461 = vmatpush1.bf16.msra.mxu0 %v3959_v33  ;;  %2625 = vmatpush1.bf16.msra.mxu1 %v3962_v34  ;;  %v4039_v33 = vld [vmem:[#allocation10 + $0x50] sm:$0xff]  }
 0x21f   : > { %2462 = vmatprep.subr.bf16.mxu0 %v3967_v35  ;;  %2626 = vmatprep.subr.bf16.mxu1 %v3970_v36  ;;  %v4040_v34 = vld [vmem:[#allocation10 + $0xd0] sm:$0xff]  }
 0x220   : > { %v4041_v35 = vld [vmem:[#allocation10 + $0x10] sm:$0xff]  }
 0x221   : > { %v4042_v36 = vld [vmem:[#allocation10 + $0x90] sm:$0xff]  }
 0x222   : > { %2463 = vmatpush1.bf16.msra.mxu0 %v3965_v37  ;;  %2627 = vmatpush1.bf16.msra.mxu1 %v3968_v38  ;;  %v4043_v37 = vld [vmem:[#allocation10 + $0x58] sm:$0xff]  }
 0x223   : > { %2464 = vmatprep.subr.bf16.mxu0 %v3973_v39  ;;  %2628 = vmatprep.subr.bf16.mxu1 %v3976_v40  ;;  %v4044_v38 = vld [vmem:[#allocation10 + $0xd8] sm:$0xff]  }
 0x224   : > { %v4045_v39 = vld [vmem:[#allocation10 + $0x18] sm:$0xff]  }
 0x225   : > { %v4046_v40 = vld [vmem:[#allocation10 + $0x98] sm:$0xff]  }
 0x226   : > { %2465 = vmatpush1.bf16.msra.mxu0 %v3971_v41  ;;  %2629 = vmatpush1.bf16.msra.mxu1 %v3974_v42  ;;  %v4047_v41 = vld [vmem:[#allocation10 + $0x60] sm:$0xff]  }
 0x227   : > { %2466 = vmatprep.subr.bf16.mxu0 %v3979_v45  ;;  %2630 = vmatprep.subr.bf16.mxu1 %v3982_v46  ;;  %v4048_v42 = vld [vmem:[#allocation10 + $0xe0] sm:$0xff]  }
 0x228   : > { %v4049_v45 = vld [vmem:[#allocation10 + $0x20] sm:$0xff]  }
 0x229   : > { %v4050_v46 = vld [vmem:[#allocation10 + $0xa0] sm:$0xff]  }
 0x22a   : > { %2467 = vmatpush1.bf16.msra.mxu0 %v3977_v47  ;;  %2631 = vmatpush1.bf16.msra.mxu1 %v3980_v48  ;;  %v4051_v47 = vld [vmem:[#allocation10 + $0x68] sm:$0xff]  }
 0x22b   : > { %2468 = vmatprep.subr.bf16.mxu0 %v3985_v49  ;;  %2632 = vmatprep.subr.bf16.mxu1 %v3988_v50  ;;  %v4052_v48 = vld [vmem:[#allocation10 + $0xe8] sm:$0xff]  }
 0x22c   : > { %v4053_v49 = vld [vmem:[#allocation10 + $0x28] sm:$0xff]  }
 0x22d   : > { %v4054_v50 = vld [vmem:[#allocation10 + $0xa8] sm:$0xff]  }
 0x22e   : > { %2469 = vmatpush1.bf16.msra.mxu0 %v3983_v51  ;;  %2633 = vmatpush1.bf16.msra.mxu1 %v3986_v52  ;;  %v4055_v51 = vld [vmem:[#allocation10 + $0x70] sm:$0xff]  }
 0x22f   : > { %2470 = vmatprep.subr.bf16.mxu0 %v3991_v53  ;;  %2634 = vmatprep.subr.bf16.mxu1 %v3994_v21  ;;  %v4056_v52 = vld [vmem:[#allocation10 + $0xf0] sm:$0xff]  }
 0x230   : > { %v4057_v53 = vld [vmem:[#allocation10 + $0x30] sm:$0xff]  }
 0x231   : > { %v4058_v21 = vld [vmem:[#allocation10 + $0xb0] sm:$0xff]  }
 0x232   : > { %2471 = vmatpush1.bf16.msra.mxu0 %v3989_v54  ;;  %2635 = vmatpush1.bf16.msra.mxu1 %v3992_v55  ;;  %v4059_v54 = vld [vmem:[#allocation10 + $0x78] sm:$0xff]  }
 0x233   : > { %2472 = vmatprep.subr.bf16.mxu0 %v3997_v56  ;;  %2636 = vmatprep.subr.bf16.mxu1 %v4000_v58  ;;  %v4060_v55 = vld [vmem:[#allocation10 + $0xf8] sm:$0xff]  }
 0x234   : > { %v4061_v56 = vld [vmem:[#allocation10 + $0x38] sm:$0xff]  }
 0x235   : > { %v4062_v58 = vld [vmem:[#allocation10 + $0xb8] sm:$0xff]  }
 0x236   : > { %2473 = vmatpush1.bf16.msra.mxu0 %v3995_v59  ;;  %2637 = vmatpush1.bf16.msra.mxu1 %v3998_v44  ;;  %v1027_v59 = vld [vmem:[%s4694_s4] sm:$0xf] }
 0x237   : > { %2474 = vmatprep.subr.bf16.mxu0 %v4003_v61  ;;  %2638 = vmatprep.subr.bf16.mxu1 %v4006_v62  ;;  %v1032_v44 = vrot.slane %v1027_v59, %v389_v7  ;;  %v1040_v61 = vrot.slane %v1027_v59, %v397_v29  ;;  %v1036_v62 = vrot.slane %v1027_v59, %v393_v9 }
 0x23a   : > { %2475 = vmatpush1.bf16.msra.mxu0 %v4001_v63  ;;  %2639 = vmatpush1.bf16.msra.mxu1 %v4004_v1  ;;  %v1044_v63 = vrot.slane %v1027_v59, %v401_v11 }
 0x23b   : > { %2476 = vmatprep.subr.bf16.mxu0 %v4009_v2  ;;  %2640 = vmatprep.subr.bf16.mxu1 %v4012_v3 }
 0x23e   : > { %2477 = vmatpush1.bf16.msra.mxu0 %v4007_v4  ;;  %2641 = vmatpush1.bf16.msra.mxu1 %v4010_v5 }
 0x23f   : > { %2478 = vmatprep.subr.bf16.mxu0 %v4015_v10  ;;  %2642 = vmatprep.subr.bf16.mxu1 %v4018_v12 }
 0x242   : > { %2479 = vmatpush1.bf16.msra.mxu0 %v4013_v13  ;;  %2643 = vmatpush1.bf16.msra.mxu1 %v4016_v43 }
 0x243   : > { %2480 = vmatprep.subr.bf16.mxu0 %v4021_v15  ;;  %2644 = vmatprep.subr.bf16.mxu1 %v4024_v16 }
 0x246   : > { %2481 = vmatpush1.bf16.msra.mxu0 %v4019_v17  ;;  %2645 = vmatpush1.bf16.msra.mxu1 %v4022_v18 }
 0x247   : > { %2482 = vmatprep.subr.bf16.mxu0 %v4027_v19  ;;  %2646 = vmatprep.subr.bf16.mxu1 %v4030_v20  ;;  %v3444_v20 = vld [vmem:[%s4696_s6] ss:$0 sm:$0xff] }
 0x24a   : > { %2483 = vmatpush1.bf16.msra.mxu0 %v4025_v22  ;;  %2647 = vmatpush1.bf16.msra.mxu1 %v4028_v23 }
 0x24b   : > { %3481 = vmatprep.subr.bf16.mxu0 %v4031_v8  ;;  %3503 = vmatprep.subr.bf16.mxu1 %v4032_v25 }
 0x24d   : > { %2485 = vmatmul.mubr.bf16.vlgmr.msra.gmra.mrb[8].mxu0 %v769_v28  ;;  %2649 = vmatmul.mubr.bf16.vlgmr.msra.gmra.mrb[8].mxu1 %v769_v28 }
 0x24e   : > { %3482 = vmatpush3.bf16.msra.mxu0 %v4033_v26  ;;  %3504 = vmatpush3.bf16.msra.mxu1 %v4034_v27 }
 0x24f   : > { %3483 = vmatprep.subr.bf16.mxu0 %v4035_v57  ;;  %3505 = vmatprep.subr.bf16.mxu1 %v4036_v30 }
 0x252   : > { %3484 = vmatpush3.bf16.msra.mxu0 %v4037_v31  ;;  %3506 = vmatpush3.bf16.msra.mxu1 %v4038_v32 }
 0x253   : > { %3485 = vmatprep.subr.bf16.mxu0 %v4039_v33  ;;  %3507 = vmatprep.subr.bf16.mxu1 %v4040_v34 }
 0x256   : > { %3486 = vmatpush3.bf16.msra.mxu0 %v4041_v35  ;;  %3508 = vmatpush3.bf16.msra.mxu1 %v4042_v36 }
 0x257   : > { %3487 = vmatprep.subr.bf16.mxu0 %v4043_v37  ;;  %3509 = vmatprep.subr.bf16.mxu1 %v4044_v38 }
 0x25a   : > { %3488 = vmatpush3.bf16.msra.mxu0 %v4045_v39  ;;  %3510 = vmatpush3.bf16.msra.mxu1 %v4046_v40 }
 0x25b   : > { %3489 = vmatprep.subr.bf16.mxu0 %v4047_v41  ;;  %3511 = vmatprep.subr.bf16.mxu1 %v4048_v42 }
 0x25e   : > { %3490 = vmatpush3.bf16.msra.mxu0 %v4049_v45  ;;  %3512 = vmatpush3.bf16.msra.mxu1 %v4050_v46 }
 0x25f   : > { %3491 = vmatprep.subr.bf16.mxu0 %v4051_v47  ;;  %3513 = vmatprep.subr.bf16.mxu1 %v4052_v48 }
 0x262   : > { %3492 = vmatpush3.bf16.msra.mxu0 %v4053_v49  ;;  %3514 = vmatpush3.bf16.msra.mxu1 %v4054_v50 }
 0x263   : > { %3493 = vmatprep.subr.bf16.mxu0 %v4055_v51  ;;  %3515 = vmatprep.subr.bf16.mxu1 %v4056_v52 }
 0x266   : > { %3494 = vmatpush3.bf16.msra.mxu0 %v4057_v53  ;;  %3516 = vmatpush3.bf16.msra.mxu1 %v4058_v21 }
 0x267   : > { %3495 = vmatprep.subr.bf16.mxu0 %v4059_v54  ;;  %3517 = vmatprep.subr.bf16.mxu1 %v4060_v55 }
 0x26a   : > { %3496 = vmatpush3.bf16.msra.mxu0 %v4061_v56  ;;  %3518 = vmatpush3.bf16.msra.mxu1 %v4062_v58 }
 0x320   : > { %v2486_v1 = vpop.f32.mrb[8].mxu0  ;;  %v2650_v2 = vpop.f32.mrb[8].mxu1 }
 0x321   : > { %v3525_v3 = vadd.f32 %v2486_v1, %v1032_v44  ;;  %v3527_v4 = vadd.f32 %v2650_v2, %v1040_v61  ;;  %v2488_v5 = vpop.f32.mrb[9].mxu0  ;;  %v2652_v0 = vpop.f32.mrb[9].mxu1 }
 0x322   : > { %v3526_v10 = vadd.f32 %v2488_v5, %v1036_v62  ;;  %v3528_v12 = vadd.f32 %v2652_v0, %v1044_v63  ;;  %v2490_v13 = vpop.f32.mrb[10].mxu0  ;;  %v2654_v43 = vpop.f32.mrb[10].mxu1 }
 0x323   : > { %v2657_v7 = vmax.f32 %v3525_v3, 0.0  ;;  %v2659_v14 = vmax.f32 %v3527_v4, 0.0  ;;  %v2491_v15 = vpop.f32.mrb[11].mxu0  ;;  %v2655_v29 = vpop.f32.mrb[11].mxu1 }
 0x324   : > { %v2658_v16 = vmax.f32 %v3526_v10, 0.0  ;;  %v2660_v17 = vmax.f32 %v3528_v12, 0.0 }
 0x325   : > { %v2661_v6 = vpack.c.bf16 %v2657_v7, %v2657_v7  ;;  %v2663_v11 = vpack.c.bf16 %v2659_v14, %v2659_v14 }
 0x326   : > { %v2662_v9 = vpack.c.bf16 %v2658_v16, %v2658_v16  ;;  %v2664_v18 = vpack.c.bf16 %v2660_v17, %v2660_v17 }
 0x328   : > { %2960 = vmatprep.mubr.bf16.mxu0 %v2662_v9  ;;  %3000 = vmatprep.mubr.bf16.mxu1 %v2664_v18 }
 0x329   : > { %2961 = vmatmul.mubr.bf16.vlgmr.msra.gmra.mrb[12].mxu0 %v2661_v6  ;;  %3001 = vmatmul.mubr.bf16.vlgmr.msra.gmra.mrb[12].mxu1 %v2663_v11 }
 0x3fc   : > { %v3497_v60 = vpop.f32.mrb[12].mxu0  ;;  %v3519_v19 = vpop.f32.mrb[12].mxu1 }
 0x3fd   : > { %v3498_v22 = vpop.f32.mrb[13].mxu0  ;;  %v3520_v23 = vpop.f32.mrb[13].mxu1 }
 0x3fe   : > { %v3499_v24 = vadd.f32 %v3498_v22, %v3497_v60  ;;  %v3521_v8 = vadd.f32 %v3520_v23, %v3519_v19  ;;  %v3500_v25 = vpop.f32.mrb[14].mxu0  ;;  %v3522_v26 = vpop.f32.mrb[14].mxu1 }
 0x3ff   : > { %v3501_v27 = vpop.f32.mrb[15].mxu0  ;;  %v3523_v28 = vpop.f32.mrb[15].mxu1 }
 0x400   : > { %v2963_v57 = vadd.f32 %v3499_v24, %v3444_v20 }
 0x402   : > { %v3003_v30 = vadd.f32 %v3521_v8, %v2963_v57 }
 0x404   : > { %v3008_v31 = vsub.f32 0.0, %v3003_v30 }
 0x406   : > { %v3009_v32 = vmul.f32 1.442695, %v3008_v31 }
 0x408   : > { %4063 = vpow2.f32 %v3009_v32 }
 0x412   : > { %v4064_v33 = vpop.eup %4063 }
 0x413   : > { %v3011_v34 = vadd.f32 1.0, %v4064_v33 }
 0x415   : > { %4065 = vrcp.f32 %v3011_v34 }
 0x41f   : > { %v4066_v35 = vpop.eup %4065 }
 0x420   : > { %3013 = vst [vmem:[%s349_s22] sm:$0xff] %v4066_v35 }
 0x421   : > { %4222 = shalt.err (!%p4219_p12)
}
 0x422   : > { %s4223_s28 = scalar_lea.hbm %s4647_s17, 128  ;;  %s4227_s21 = scalar_lea.hbm %s4697_s7, 384 }
 0x423   : > { %p4224_p13 = scmp.ne.s32.totalorder %s4647_s17, %s4223_s28  ;;  %p4228_p8 = scmp.lt.u32.totalorder %s4647_s17, %s4697_s7 }
 0x424   : > { %p4229_p9 = scmp.lt.u32.totalorder %s4227_s21, %s4223_s28  ;;  %p4231_p5 = scmp.lt.u32.totalorder %s4223_s28, %s4647_s17 }
 0x425   : > { %p4225_p1 = pnand %p4224_p13, %p4715_p0 }
 0x426   : > { %p4230_p7 = por %p4229_p9, %p4228_p8 }
 0x427   : > { %p4226_p6 = pneg %p4225_p1 }
 0x428   : > { %p4232_p2 = por %p4231_p5, %p4230_p7 }
 0x42a   : > { %p4233_p4 = pnand %p4232_p2, %p4226_p6 }
 0x42c   : > { %4236 = shalt.err (!%p4233_p4)
}
 0x42d   : > { %3571 = dma.vmem_to_hbm [thread:$0]  (%p4715_p0), %s4649_s12, 128, %s4647_s17, %s3015_s11  }
 0x42e PF: > { %p3603_p10 = scmp.ge.s32.totalorder %s4283_s27, 2  ;;  %s3040_s20 = sand.u32 1, %s4271_s24  }
 0x42f   : > { %p4716_p11 = scmp.ne.s32.totalorder %s4708_s15, 0  ;;  %s3041_s16 = scalar_lea.sflag [#allocation4], %s3040_s20 }
 0x431   : > { %p3591_p3 = pnand %p3603_p10, %p4716_p11 }
 0x433   : > { %4266 = dma.done.wait (!%p3591_p3), %s3041_s16, 128  }
 0x434   : > { %4268 = vsyncadd (!%p3591_p3), %s3041_s16, 4294967168  ;;  %p22_p12 = scmp.ge.s32.totalorder %s4473_s29, 5   ;;  %s4717_s24 = smov %s4275_s25 }
 0x435   : > { %s4718_s25 = smov %s4279_s26  ;;  %s4719_s26 = smov %s4484_s9 }
 0x436   : > { %s4720_s27 = smov %s4473_s29  ;;  %24 = sbr.rel (!%p22_p12) target bundleno = 7 (0x7), region = 109 }
 0x43d   :  { %3046 = vsyncpa [#allocation3], 1 }
 0x43e   :  { %3048 = vsyncpa [#allocation3 + $0x1], 1 }
 0x43f   :  { %3049 = vsyncpa [#allocation6], 1 }
 0x440   :  { %3050 = vsyncpa [#allocation9], 1 }
 0x441   :  { %3051 = vsyncpa [#allocation4], 1 }
 0x442   :  { %3053 = vsyncpa [#allocation4 + $0x1], 1 }

</bundles_post_ra>
